<compile_context>
chip_gen: v7x
topology: tpu7x:2x2x1
jax: 0.10.0
libtpu: 0.0.40
codegen_flags: <defaults>
</compile_context>

<pallas_src>
import functools

import jax
import jax.numpy as jnp
from jax.experimental import pallas as pl
from jax.experimental.pallas import tpu as pltpu


def _round_up(x, m):
    return ((x + m - 1) // m) * m


def _conv_layer_kernel(lo_ref, hi_ref, w_ref, b_ref, o_ref, *,
                       ksize, th, wo, cpad, norm_type, relu_type):
    """One (batch, output-row-block) grid step.

    lo_ref: (TH, Wp, Cin)     padded-input rows [h*TH, (h+1)*TH)       (VMEM)
    hi_ref: (HALO, Wp, Cin)   rows starting at (h+1)*TH (K-1 used)     (VMEM)
    w_ref:  (K*K*Cin, Cpad)   conv weights, taps stacked on rows       (VMEM)
    b_ref:  (1, Cpad)         conv bias, f32                           (VMEM)
    o_ref:  (TH, Wo, Cpad)    output row block                         (VMEM)
    """
    cin = lo_ref.shape[-1]
    kkc = ksize * ksize * cin

    # Build the (TH + K - 1)-row window once: main block + K-1 halo rows.
    # Every conv tap below is then a pure static slice of this window.
    if ksize > 1:
        window = jnp.concatenate([lo_ref[...], hi_ref[0:ksize - 1]], axis=0)
    else:
        window = lo_ref[...]

    # In-kernel im2col: all K*K taps concatenated on the channel axis so the
    # whole conv is ONE MXU matmul with contraction depth K*K*Cin (instead of
    # K*K shallow Cin-deep dots accumulated through a spilling f32 chain).
    taps = [window[kh:kh + th, kw:kw + wo, :]
            for kh in range(ksize) for kw in range(ksize)]
    patch = taps[0] if len(taps) == 1 else jnp.concatenate(taps, axis=-1)
    patch = patch.reshape(th * wo, kkc)

    acc = jnp.dot(patch, w_ref[...], preferred_element_type=jnp.float32)
    acc = acc + b_ref[...]                                   # broadcast (1, Cpad)

    # NormLayer (zero channel padding, if any, does not perturb the norm).
    if norm_type == 'pixel':
        sumsq = jnp.sum(acc * acc, axis=-1, keepdims=True)
        acc = acc * jax.lax.rsqrt(jnp.maximum(sumsq, 1e-24))  # EUP rsqrt + VPU mul

    # ReluLayer
    if relu_type == 'relu':
        acc = jnp.maximum(acc, 0.0)
    elif relu_type == 'leakyrelu':
        acc = jnp.where(acc > 0.0, acc, 0.2 * acc)
    elif relu_type == 'selu':
        acc = jax.nn.selu(acc)
    # 'none' -> pass

    o_ref[...] = acc.reshape(th, wo, cpad).astype(o_ref.dtype)


def _vmem_capacity_bytes():
    try:
        return int(pltpu.get_tpu_info().vmem_capacity_bytes)
    except Exception:
        return 64 << 20            # conservative default (v7x per-core VMEM)


def _pick_row_block(ho, wo, wp, cin, cpad, kkc, in_item, out_item, ksize,
                    halo, budget):
    """Biggest row block (multiple of HALO) whose per-step footprint fits."""

    def footprint(t):
        lo = 2 * t * wp * cin * in_item              # double-buffered main block
        hi = 2 * halo * wp * cin * in_item           # double-buffered halo block
        out = 2 * t * wo * cpad * out_item           # double-buffered output block
        win = (t + ksize - 1) * wp * cin * in_item   # window temporary
        im2col = t * wo * kkc * in_item              # im2col patch temporary
        acc = 2 * t * wo * cpad * 4                  # f32 dot result + epilogue
        wgt = 2 * (kkc * cpad * in_item + cpad * 4)  # resident weights + bias
        return lo + hi + out + win + im2col + acc + wgt

    th = min(_round_up(ho, halo),
             max(halo, _round_up(pl.cdiv(4096, max(wo, 1)), halo)))
    while th > halo and footprint(th) > budget:
        th = max(halo, ((th // 2) // halo) * halo)
    return th


def conv_layer_forward(x_nchw, weight_hwio, bias, *, kernel_size=3, scale='none',
                       norm_type='none', relu_type='none', use_pad=True):
    """Pallas implementation of ConvLayer.forward.

    x_nchw:      (N, Cin, H, W)      -- PyTorch layout
    weight_hwio: (K, K, Cin, Cout)   -- conv weight in HWIO
    bias:        (Cout,) or None
    """
    norm_type = norm_type.lower()
    relu_type = relu_type.lower()
    if norm_type not in ('pixel', 'none'):
        # TODO(synk): 'bn'/'in'/'gn'/'layer' need running stats / learned affine params.
        raise NotImplementedError(f"norm_type '{norm_type}' not supported by this kernel")
    if relu_type not in ('relu', 'leakyrelu', 'selu', 'none'):
        # TODO(synk): 'prelu' needs a learned per-channel slope parameter.
        raise NotImplementedError(f"relu_type '{relu_type}' not supported by this kernel")

    K = kernel_size
    # TODO(synk): fold the 2x nearest-neighbour upsample into the input index_map
    # instead of materializing a 4x larger intermediate in HBM.
    if scale == 'up':
        x_nchw = jnp.repeat(jnp.repeat(x_nchw, 2, axis=2), 2, axis=3)
    stride = 2 if scale == 'down' else 1

    x = jnp.transpose(x_nchw, (0, 2, 3, 1))                  # NCHW -> NHWC
    # TODO(synk): fuse reflect pad (and the NCHW<->NHWC transposes) into the
    # kernel via an edge-aware index_map to remove these extra HBM round trips.
    if use_pad:
        p = K // 2
        x = jnp.pad(x, ((0, 0), (p, p), (p, p), (0, 0)), mode='reflect')

    N, Hp, Wp, Cin = x.shape
    Ho = Hp - K + 1                                          # stride-1 "valid" output
    Wo = Wp - K + 1
    Cout = weight_hwio.shape[-1]
    KKC = K * K * Cin

    # Lane-dense (multiple-of-128) channel padding only when Cout is already
    # large; for small Cout write the exact width (masked stores) so we do not
    # inflate output HBM traffic 128/Cout-fold or need a wrapper-side slice.
    # TODO(synk): round to 256 when Cout >= 256 on v6e/v7x for full MXU width.
    Cpad = Cout if Cout < 128 else _round_up(Cout, 128)

    if bias is None:                                         # norm_type not in ['pixel','none']
        bias = jnp.zeros((Cout,), x.dtype)

    # Pack weights/bias: (K,K,Cin,Cout) -> (K*K*Cin, Cpad); bias -> (1, Cpad) f32.
    w2d = weight_hwio.reshape(KKC, Cout)
    b2d = bias.reshape(1, Cout).astype(jnp.float32)
    if Cpad != Cout:
        w2d = jnp.pad(w2d, ((0, 0), (0, Cpad - Cout)))
        b2d = jnp.pad(b2d, ((0, 0), (0, Cpad - Cout)))

    in_item = x.dtype.itemsize
    out_item = in_item
    HALO = max(8, _round_up(max(K - 1, 1), 8))               # halo block rows

    phys_vmem = _vmem_capacity_bytes()                       # 64 MiB v7x, 128 MiB v5e/v6e
    vmem_limit = int(min(phys_vmem, 128 << 20) * 3 // 4)
    budget = vmem_limit // 2

    TH = _pick_row_block(Ho, Wo, Wp, Cin, Cpad, KKC, in_item, out_item, K,
                         HALO, budget)
    # v7x has 2 TensorCores: make sure the parallel grid exposes >= 2 steps.
    if N * pl.cdiv(Ho, TH) < 2 and TH > HALO:
        TH = max(HALO, _round_up(pl.cdiv(Ho, 2), HALO))

    HB = pl.cdiv(Ho, TH)                                     # output row blocks
    NHALO = pl.cdiv(Hp, HALO)                                # halo blocks along rows
    th_blocks = TH // HALO                                   # TH is a multiple of HALO

    def lo_map(n, h):
        return (n, h, 0, 0)

    def hi_map(n, h):
        # K-1 halo rows start at padded-input row (h+1)*TH; clamp for the last
        # block (clamped/garbage rows only feed output rows whose stores Pallas
        # masks off).
        return (n, jnp.minimum((h + 1) * th_blocks, NHALO - 1), 0, 0)

    kernel = functools.partial(_conv_layer_kernel, ksize=K, th=TH, wo=Wo,
                               cpad=Cpad, norm_type=norm_type, relu_type=relu_type)

    flops = 2 * N * Ho * Wo * KKC * Cpad
    bytes_accessed = int(x.size * in_item * (1.0 + HALO / TH)
                         + w2d.size * w2d.dtype.itemsize + b2d.size * 4
                         + N * Ho * Wo * Cpad * out_item)
    transcendentals = (N * Ho * Wo * Cpad if relu_type == 'selu'
                       else (N * Ho * Wo if norm_type == 'pixel' else 0))

    out = pl.pallas_call(
        kernel,
        grid=(N, HB),
        in_specs=[
            pl.BlockSpec((None, TH, Wp, Cin), lo_map),                 # main row block
            pl.BlockSpec((None, HALO, Wp, Cin), hi_map),               # K-1 halo rows
            # TODO(synk): pipeline_mode=pl.Buffered(1) would halve VMEM for these
            # grid-invariant blocks; left at the default for compatibility.
            pl.BlockSpec((KKC, Cpad), lambda n, h: (0, 0)),            # weights (resident)
            pl.BlockSpec((1, Cpad), lambda n, h: (0, 0)),              # bias (resident)
        ],
        out_specs=pl.BlockSpec((None, TH, Wo, Cpad), lambda n, h: (n, h, 0, 0)),
        out_shape=jax.ShapeDtypeStruct((N, Ho, Wo, Cpad), x.dtype),
        compiler_params=pltpu.CompilerParams(
            dimension_semantics=("parallel", "parallel"),
            vmem_limit_bytes=vmem_limit),
        cost_estimate=pl.CostEstimate(flops=flops,
                                      transcendentals=transcendentals,
                                      bytes_accessed=bytes_accessed),
    )(x, x, w2d, b2d)

    if Cpad != Cout:
        out = out[..., :Cout]                                # drop lane padding
    if stride == 2:
        # TODO(synk): compute only the strided rows/cols inside the kernel
        # (stride-1 conv + subsample does ~4x the work for scale='down').
        out = out[:, ::2, ::2, :]

    return jnp.transpose(out, (0, 3, 1, 2))                  # NHWC -> NCHW


if __name__ == "__main__":
    key = jax.random.PRNGKey(0)
    kx, kw, kb = jax.random.split(key, 3)

    # small shapes consistent with the module (default ConvLayer config)
    N, Cin, H, W = 2, 4, 16, 16
    Cout, K = 8, 3

    x = jax.random.normal(kx, (N, Cin, H, W), jnp.float32)

    # deterministic in-script parameter init (PyTorch Conv2d layout (Cout,Cin,K,K))
    fan_in = Cin * K * K
    bound = 1.0 / (fan_in ** 0.5)
    w_torch = jax.random.uniform(kw, (Cout, Cin, K, K), jnp.float32, -bound, bound)
    b = jax.random.uniform(kb, (Cout,), jnp.float32, -bound, bound)
    w_hwio = jnp.transpose(w_torch, (2, 3, 1, 0))            # (K, K, Cin, Cout)

    # pure-JAX reference: reflection pad -> stride-1 conv -> + bias
    x_nhwc = jnp.transpose(x, (0, 2, 3, 1))
    x_pad = jnp.pad(x_nhwc, ((0, 0), (1, 1), (1, 1), (0, 0)), mode='reflect')
    conv_ref = jax.lax.conv_general_dilated(
        x_pad, w_hwio, window_strides=(1, 1), padding='VALID',
        dimension_numbers=('NHWC', 'HWIO', 'NHWC')) + b.reshape(1, 1, 1, Cout)
    conv_ref_nchw = jnp.transpose(conv_ref, (0, 3, 1, 2))

    # 1) default config: scale='none', norm_type='none', relu_type='none'
    out = conv_layer_forward(x, w_hwio, b, kernel_size=K, scale='none',
                             norm_type='none', relu_type='none', use_pad=True)
    out = jax.block_until_ready(out)
    assert out.shape == (N, Cout, H, W), out.shape
    assert jnp.allclose(out, conv_ref_nchw, atol=1e-4, rtol=1e-4), "mismatch (default)"

    # 2) fused epilogue: pixel norm + leaky relu
    out2 = conv_layer_forward(x, w_hwio, b, kernel_size=K, scale='none',
                              norm_type='pixel', relu_type='leakyrelu', use_pad=True)
    out2 = jax.block_until_ready(out2)
    nrm = jnp.sqrt(jnp.sum(conv_ref_nchw * conv_ref_nchw, axis=1, keepdims=True))
    ref2 = conv_ref_nchw / jnp.maximum(nrm, 1e-12)
    ref2 = jnp.where(ref2 > 0, ref2, 0.2 * ref2)
    assert jnp.allclose(out2, ref2, atol=1e-4, rtol=1e-4), "mismatch (pixel+leakyrelu)"

    print("KERNEL_OK")
</pallas_src>

<mosaic_0001>
module attributes {stable_mosaic.version = 11 : i64} {
  func.func @_conv_layer_kernel(%arg0: i32, %arg1: i32, %arg2: memref<1x16x18x4xf32, #tpu.memory_space<vmem>>, %arg3: memref<1x8x18x4xf32, #tpu.memory_space<vmem>>, %arg4: memref<36x8xf32, #tpu.memory_space<vmem>>, %arg5: memref<1x8xf32, #tpu.memory_space<vmem>>, %arg6: memref<1x16x16x8xf32, #tpu.memory_space<vmem>>) attributes {dimension_semantics = [#tpu.dimension_semantics<parallel>, #tpu.dimension_semantics<parallel>], iteration_bounds = array<i64: 2, 1>, scalar_prefetch = 0 : i64, scratch_operands = 0 : i64, tpu.core_type = #tpu.core_type<tc>, window_params = [{transform_indices = @transform_0, window_bounds = array<i64: 1, 16, 18, 4>}, {transform_indices = @transform_1, window_bounds = array<i64: 1, 8, 18, 4>}, {pipeline_mode = #tpu.pipeline_mode<synchronous>, transform_indices = @transform_2, window_bounds = array<i64: 36, 8>}, {pipeline_mode = #tpu.pipeline_mode<synchronous>, transform_indices = @transform_3, window_bounds = array<i64: 1, 8>}, {transform_indices = @transform_4, window_bounds = array<i64: 1, 16, 16, 8>}]} {
    %c0 = arith.constant 0 : index
    %c0_0 = arith.constant 0 : index
    %c0_1 = arith.constant 0 : index
    %c0_2 = arith.constant 0 : index
    %0 = vector.load %arg2[%c0, %c0_0, %c0_1, %c0_2] : memref<1x16x18x4xf32, #tpu.memory_space<vmem>>, vector<1x16x18x4xf32>
    %1 = vector.shape_cast %0 : vector<1x16x18x4xf32> to vector<16x18x4xf32>
    %c0_3 = arith.constant 0 : index
    %c0_4 = arith.constant 0 : index
    %c0_5 = arith.constant 0 : index
    %c0_6 = arith.constant 0 : index
    %2 = vector.load %arg3[%c0_3, %c0_4, %c0_5, %c0_6] : memref<1x8x18x4xf32, #tpu.memory_space<vmem>>, vector<1x2x18x4xf32>
    %3 = vector.shape_cast %2 : vector<1x2x18x4xf32> to vector<2x18x4xf32>
    %4 = tpu.concatenate %1, %3 in 0 : vector<16x18x4xf32>, vector<2x18x4xf32> -> vector<18x18x4xf32>
    %5 = vector.extract_strided_slice %4 {offsets = [0, 0, 0], sizes = [16, 16, 4], strides = [1, 1, 1]} : vector<18x18x4xf32> to vector<16x16x4xf32>
    %6 = vector.extract_strided_slice %4 {offsets = [0, 1, 0], sizes = [16, 16, 4], strides = [1, 1, 1]} : vector<18x18x4xf32> to vector<16x16x4xf32>
    %7 = vector.extract_strided_slice %4 {offsets = [0, 2, 0], sizes = [16, 16, 4], strides = [1, 1, 1]} : vector<18x18x4xf32> to vector<16x16x4xf32>
    %8 = vector.extract_strided_slice %4 {offsets = [1, 0, 0], sizes = [16, 16, 4], strides = [1, 1, 1]} : vector<18x18x4xf32> to vector<16x16x4xf32>
    %9 = vector.extract_strided_slice %4 {offsets = [1, 1, 0], sizes = [16, 16, 4], strides = [1, 1, 1]} : vector<18x18x4xf32> to vector<16x16x4xf32>
    %10 = vector.extract_strided_slice %4 {offsets = [1, 2, 0], sizes = [16, 16, 4], strides = [1, 1, 1]} : vector<18x18x4xf32> to vector<16x16x4xf32>
    %11 = vector.extract_strided_slice %4 {offsets = [2, 0, 0], sizes = [16, 16, 4], strides = [1, 1, 1]} : vector<18x18x4xf32> to vector<16x16x4xf32>
    %12 = vector.extract_strided_slice %4 {offsets = [2, 1, 0], sizes = [16, 16, 4], strides = [1, 1, 1]} : vector<18x18x4xf32> to vector<16x16x4xf32>
    %13 = vector.extract_strided_slice %4 {offsets = [2, 2, 0], sizes = [16, 16, 4], strides = [1, 1, 1]} : vector<18x18x4xf32> to vector<16x16x4xf32>
    %14 = tpu.concatenate %5, %6, %7, %8, %9, %10, %11, %12, %13 in 2 : vector<16x16x4xf32>, vector<16x16x4xf32>, vector<16x16x4xf32>, vector<16x16x4xf32>, vector<16x16x4xf32>, vector<16x16x4xf32>, vector<16x16x4xf32>, vector<16x16x4xf32>, vector<16x16x4xf32> -> vector<16x16x36xf32>
    %15 = vector.shape_cast %14 : vector<16x16x36xf32> to vector<256x36xf32>
    %c0_7 = arith.constant 0 : index
    %c0_8 = arith.constant 0 : index
    %16 = vector.load %arg4[%c0_7, %c0_8] : memref<36x8xf32, #tpu.memory_space<vmem>>, vector<36x8xf32>
    %cst = arith.constant dense<0.000000e+00> : vector<256x8xf32>
    %17 = tpu.matmul %15, %16, %cst {dimension_numbers = #tpu.dot_dimension_numbers<[1], [0], [0], [1], [0, 0, 1, 1], [], []>} : vector<256x36xf32>, vector<36x8xf32>, vector<256x8xf32> -> vector<256x8xf32>
    %c0_9 = arith.constant 0 : index
    %c0_10 = arith.constant 0 : index
    %18 = vector.load %arg5[%c0_9, %c0_10] : memref<1x8xf32, #tpu.memory_space<vmem>>, vector<1x8xf32>
    %19 = vector.broadcast %18 : vector<1x8xf32> to vector<256x8xf32>
    %20 = arith.addf %17, %19 : vector<256x8xf32>
    %21 = vector.shape_cast %20 : vector<256x8xf32> to vector<16x16x8xf32>
    %c0_11 = arith.constant 0 : index
    %c0_12 = arith.constant 0 : index
    %c0_13 = arith.constant 0 : index
    %c0_14 = arith.constant 0 : index
    %22 = vector.load %arg6[%c0_11, %c0_12, %c0_13, %c0_14] : memref<1x16x16x8xf32, #tpu.memory_space<vmem>>, vector<1x16x16x8xf32>
    %23 = vector.shape_cast %22 : vector<1x16x16x8xf32> to vector<16x16x8xf32>
    %24 = vector.shape_cast %21 : vector<16x16x8xf32> to vector<1x16x16x8xf32>
    tpu.vector_store %arg6[%c0_11, %c0_12, %c0_13, %c0_14], %24 {strides = array<i32>} : memref<1x16x16x8xf32, #tpu.memory_space<vmem>>, vector<1x16x16x8xf32>,
    return
  }
  func.func @transform_0(%arg0: i32, %arg1: i32) -> (i32, i32, i32, i32) {
    %c0_i32 = arith.constant 0 : i32
    %c0_i32_0 = arith.constant 0 : i32
    %c0_i32_1 = arith.constant 0 : i32
    return %arg0, %arg1, %c0_i32, %c0_i32_0 : i32, i32, i32, i32
  }
  func.func @transform_1(%arg0: i32, %arg1: i32) -> (i32, i32, i32, i32) {
    %c1_i32 = arith.constant 1 : i32
    %0 = arith.addi %arg1, %c1_i32 : i32
    %c2_i32 = arith.constant 2 : i32
    %1 = arith.muli %0, %c2_i32 : i32
    %c2_i32_0 = arith.constant 2 : i32
    %2 = arith.minsi %1, %c2_i32_0 : i32
    %c0_i32 = arith.constant 0 : i32
    %c0_i32_1 = arith.constant 0 : i32
    %c0_i32_2 = arith.constant 0 : i32
    return %arg0, %2, %c0_i32, %c0_i32_1 : i32, i32, i32, i32
  }
  func.func @transform_2(%arg0: i32, %arg1: i32) -> (i32, i32) {
    %c0_i32 = arith.constant 0 : i32
    %c0_i32_0 = arith.constant 0 : i32
    %c0_i32_1 = arith.constant 0 : i32
    return %c0_i32, %c0_i32_0 : i32, i32
  }
  func.func @transform_3(%arg0: i32, %arg1: i32) -> (i32, i32) {
    %c0_i32 = arith.constant 0 : i32
    %c0_i32_0 = arith.constant 0 : i32
    %c0_i32_1 = arith.constant 0 : i32
    return %c0_i32, %c0_i32_0 : i32, i32
  }
  func.func @transform_4(%arg0: i32, %arg1: i32) -> (i32, i32, i32, i32) {
    %c0_i32 = arith.constant 0 : i32
    %c0_i32_0 = arith.constant 0 : i32
    %c0_i32_1 = arith.constant 0 : i32
    return %arg0, %arg1, %c0_i32, %c0_i32_0 : i32, i32, i32, i32
  }
}

</mosaic_0001>

<bundles_post_ra>
// kernel: tpu_custom_call.1
= control target key start
LH: loop header
LB: loop body
LE: loop exit
PB: predicated region body
PF: predicated region fallthrough
CT: control target
= control target key end

     0   :  { %s2435_s15 = smov 0   ;;  %s2437_s16 = smov 0   ;;  %s4251_s0 = inlined_call_operand.vmem [shape: f32[2,18,18,4], index: 0, kind: input, shape index: {}]   ;;  %s4252_s1 = inlined_call_operand.vmem [shape: f32[2,18,18,4], index: 1, kind: input, shape index: {}]   ;;  %s4253_s2 = inlined_call_operand.vmem [shape: f32[36,8], index: 2, kind: input, shape index: {}]   ;;  %s4254_s3 = inlined_call_operand.vmem [shape: f32[1,8], index: 3, kind: input, shape index: {}]   ;;  %s4255_s4 = inlined_call_operand.vmem [shape: f32[2,16,16,8], index: 4, kind: output, shape index: {}]  }
   0x1   :  { %s2439_s17 = smov 0  }
   0x2 LB: > { %s26_s18 = sadd.s32 1, %s2396_s16  ;;  %p2172_p0 = scmp.ge.s32.totalorder %s2400_s17, 1  ;;  %s2400_s17 = sphi %s2439_s17, %s14_s17   ;;  %s2396_s16 = sphi %s2437_s16, %s4540_s16   ;;  %s2392_s15 = sphi %s2435_s15, %s4539_s15  }
   0x3   : > { %p28_p1 = scmp.ge.s32.totalorder %s26_s18, 2  ;;  %p238_p2 = scmp.lt.s32.totalorder %s2400_s17, 3 }
   0x5   : > { %s4542_s18 = smov (%p28_p1, %s26_s18), 0  ;;  %p239_p3 = pnand %p2172_p0, %p238_p2 }
   0x7   : > { %242 = sbr.rel (%p239_p3) target bundleno = 865 (0x361), region = 36 }
   0xe   : > { %p304_p4 = scmp.lt.s32.totalorder %s2392_s15, 1  ;;  %vm461_vm0 = vcmask 1046528   ;;  %s2402_s23 = smov 4   ;;  %vm638_vm1 = vcmask 1045504   ;;  %vm1790_vm2 = vcmask 1043456   ;;  %vm1417_vm3 = vcmask 31744  }
   0xf   : > { %s2403_s24 = smov 8   ;;  %s2404_s25 = smov 12   ;;  %vm1450_vm4 = vcmask 64512   ;;  %vm1483_vm5 = vcmask 97280   ;;  %vm1516_vm6 = vcmask 130048   ;;  %vm1549_vm7 = vcmask 162816  }
  0x10   : > { %s4544_s15 = smov (!%p304_p4, %s2392_s15), 1  ;;  %s2405_s30 = smov 16   ;;  %vm1582_vm8 = vcmask 195584   ;;  %vm1615_vm9 = vcmask 228352   ;;  %vm1648_vm10 = vcmask 261120   ;;  %vm1693_vm11 = vcmask 293888  }
  0x11   : > { %s2325_s19 = smul.u32 432, %s4544_s15  ;;  %s2406_s5 = smov 20  }
  0x12   : > { %s2407_s6 = smov 24   ;;  %s2408_s11 = smov 28  }
  0x13   : > { %s2461_s22 = scalar_lea.vmem %s4251_s0, %s2325_s19  ;;  %s2214_s26 = sadd.s32 384, %s2325_s19 }
  0x14   : > { %v2464_v0 = vld [vmem:[%s2461_s22 + $0x18] sm:$0xff]  ;;  %v2467_v1 = vld [vmem:[%s2461_s22 + $0x20] sm:$0xff]  ;;  %v2475_v5 = vld [vmem:[%s2461_s22 + $0x8] sm:$0xff]  ;;  %s3142_s29 = scalar_lea.vmem %s4252_s1, %s2214_s26 }
  0x15   : > { %v2470_v2 = vld [vmem:[%s2461_s22] sm:$0xff]  ;;  %v467_v3 = vrot.slane %v2464_v0, 1  ;;  %v468_v4 = vrot.slane %v2467_v1, 1  ;;  %v2479_v7 = vld [vmem:[%s2461_s22 + $0x28] sm:$0x3]  ;;  %v463_v8 = vrot.slane %v2475_v5, 1 }
  0x16   : > { %v462_v6 = vrot.slane %v2470_v2, 1  ;;  %v470_v9 = vrot.slane %v2479_v7, 1  ;;  %v2484_v10 = vld [vmem:[%s2461_s22 + $0x10] sm:$0x3]  ;;  %v2487_v11 = vld [vmem:[%s2461_s22 + $0x38] sm:$0xff]  ;;  %v2517_v24 = vld [vmem:[%s2461_s22 + $0x48] sm:$0xff] }
  0x17   : > { %v2490_v12 = vsel %vm461_vm0, %v467_v3, %v468_v4  ;;  %v465_v13 = vrot.slane %v2484_v10, 1  ;;  %v2494_v14 = vld [vmem:[%s2461_s22 + $0x40] sm:$0x3]  ;;  %v2497_v15 = vld [vmem:[%s2461_s22 + $0x30] sm:$0xff]  ;;  %v473_v18 = vrot.slane %v2487_v11, 1  ;;  %v477_v29 = vrot.slane %v2517_v24, 1 }
  0x18   : > { %546 = vrot.lane.b32.xlu1 %v2490_v12, %s2402_s23  ;;  %v464_v16 = vsel %vm461_vm0, %v462_v6, %v463_v8  ;;  %v2504_v17 = vsel %vm461_vm0, %v468_v4, %v470_v9  ;;  %v475_v19 = vrot.slane %v2494_v14, 1  ;;  %v472_v21 = vrot.slane %v2497_v15, 1  ;;  %v2511_v22 = vld [vmem:[%s2461_s22 + $0x50] sm:$0xff]  ;;  %v2514_v23 = vld [vmem:[%s2461_s22 + $0x58] sm:$0x3]  ;;  %v2532_v30 = vld [vmem:[%s2461_s22 + $0x68] sm:$0xff] }
  0x19   : > { %542 = vrot.lane.b32.xlu0 %v464_v16, %s2402_s23  ;;  %v466_v20 = vsel %vm461_vm0, %v463_v8, %v465_v13  ;;  %v478_v26 = vrot.slane %v2511_v22, 1  ;;  %v480_v27 = vrot.slane %v2514_v23, 1  ;;  %v2535_v31 = vld [vmem:[%s2461_s22 + $0x70] sm:$0x3]  ;;  %v2538_v32 = vld [vmem:[%s2461_s22 + $0x60] sm:$0xff]  ;;  %v483_v34 = vrot.slane %v2532_v30, 1 }
  0x1a   : > { %v2523_v25 = vsel %vm461_vm0, %v473_v18, %v475_v19  ;;  %v2528_v28 = vsel %vm461_vm0, %v472_v21, %v473_v18  ;;  %v485_v35 = vrot.slane %v2535_v31, 1  ;;  %v482_v37 = vrot.slane %v2538_v32, 1  ;;  %v2554_v38 = vld [vmem:[%s2461_s22 + $0x80] sm:$0xff]  ;;  %v2557_v39 = vld [vmem:[%s2461_s22 + $0x88] sm:$0x3]  ;;  %v2560_v40 = vld [vmem:[%s2461_s22 + $0x78] sm:$0xff] }
  0x1b   : > { %v2545_v33 = vsel %vm461_vm0, %v478_v26, %v480_v27  ;;  %v2550_v36 = vsel %vm461_vm0, %v477_v29, %v478_v26  ;;  %v488_v42 = vrot.slane %v2554_v38, 1  ;;  %v490_v43 = vrot.slane %v2557_v39, 1  ;;  %v2576_v46 = vld [vmem:[%s2461_s22 + $0x98] sm:$0xff]  ;;  %v2579_v47 = vld [vmem:[%s2461_s22 + $0xa0] sm:$0x3]  ;;  %v2582_v48 = vld [vmem:[%s2461_s22 + $0x90] sm:$0xff] }
  0x1c   : > { %548 = vrot.lane.b32.xlu1 %v2504_v17, %s2402_s23  ;;  %4360 = vst [vmem:[#allocation2_spill] sm:$0xff] %v2550_v36  ;;  %v2567_v41 = vsel %vm461_vm0, %v483_v34, %v485_v35  ;;  %v2572_v44 = vsel %vm461_vm0, %v482_v37, %v483_v34  ;;  %v487_v45 = vrot.slane %v2560_v40, 1  ;;  %v493_v50 = vrot.slane %v2576_v46, 1  ;;  %v2598_v54 = vld [vmem:[%s2461_s22 + $0xb0] sm:$0xff]  ;;  %v2601_v55 = vld [vmem:[%s2461_s22 + $0xb8] sm:$0x3] }
  0x1d   : > { %544 = vrot.lane.b32.xlu0 %v466_v20, %s2402_s23  ;;  %4361 = vst [vmem:[#allocation3_spill] sm:$0xff] %v2567_v41  ;;  %4362 = vst [vmem:[#allocation4_spill] sm:$0xff] %v2572_v44  ;;  %v2589_v49 = vsel %vm461_vm0, %v488_v42, %v490_v43  ;;  %v495_v51 = vrot.slane %v2579_v47, 1  ;;  %v492_v53 = vrot.slane %v2582_v48, 1  ;;  %v2604_v56 = vld [vmem:[%s2461_s22 + $0xa8] sm:$0xff]  ;;  %v498_v58 = vrot.slane %v2598_v54, 1 }
  0x1e   : > { %4363 = vst [vmem:[#allocation5_spill] sm:$0xff] %v2589_v49  ;;  %v2594_v52 = vsel %vm461_vm0, %v487_v45, %v488_v42  ;;  %v500_v59 = vrot.slane %v2601_v55, 1  ;;  %v497_v61 = vrot.slane %v2604_v56, 1  ;;  %v2620_v62 = vld [vmem:[%s2461_s22 + $0xc8] sm:$0xff]  ;;  %v2623_v63 = vld [vmem:[%s2461_s22 + $0xd0] sm:$0x3] }
  0x1f   : > { %4364 = vst [vmem:[#allocation6_spill] sm:$0xff] %v2594_v52  ;;  %v2611_v57 = vsel %vm461_vm0, %v493_v50, %v495_v51  ;;  %v2616_v60 = vsel %vm461_vm0, %v492_v53, %v493_v50  ;;  %v2626_v3 = vld [vmem:[%s2461_s22 + $0xc0] sm:$0xff]  ;;  %v503_v6 = vrot.slane %v2620_v62, 1  ;;  %v505_v8 = vrot.slane %v2623_v63, 1  ;;  %v2645_v18 = vld [vmem:[%s2461_s22 + $0xe8] sm:$0x3] }
  0x20   : > { %552 = vrot.lane.b32.xlu1 %v2523_v25, %s2402_s23  ;;  %4365 = vst [vmem:[#allocation7_spill] sm:$0xff] %v2611_v57  ;;  %4366 = vst [vmem:[#allocation8_spill] sm:$0xff] %v2616_v60  ;;  %v2633_v4 = vsel %vm461_vm0, %v498_v58, %v500_v59  ;;  %v2638_v9 = vsel %vm461_vm0, %v497_v61, %v498_v58  ;;  %v502_v13 = vrot.slane %v2626_v3, 1  ;;  %v2642_v16 = vld [vmem:[%s2461_s22 + $0xe0] sm:$0xff]  ;;  %v2648_v19 = vld [vmem:[%s2461_s22 + $0xd8] sm:$0xff]  ;;  %v510_v26 = vrot.slane %v2645_v18, 1 }
  0x21   : > { %550 = vrot.lane.b32.xlu0 %v2528_v28, %s2402_s23  ;;  %4367 = vst [vmem:[#allocation9_spill] sm:$0xff] %v2633_v4  ;;  %4368 = vst [vmem:[#allocation10_spill] sm:$0xff] %v2638_v9  ;;  %v2655_v20 = vsel %vm461_vm0, %v503_v6, %v505_v8  ;;  %v508_v21 = vrot.slane %v2642_v16, 1  ;;  %v507_v29 = vrot.slane %v2648_v19, 1  ;;  %v2664_v34 = vld [vmem:[%s2461_s22 + $0xf8] sm:$0xff]  ;;  %v2670_v37 = vld [vmem:[%s2461_s22 + $0xf0] sm:$0xff] }
  0x22   : > { %4369 = vst [vmem:[#allocation11_spill] sm:$0xff] %v2655_v20  ;;  %v2660_v27 = vsel %vm461_vm0, %v502_v13, %v503_v6  ;;  %v2667_v35 = vld [vmem:[%s2461_s22 + $0x100] sm:$0x3]  ;;  %v513_v43 = vrot.slane %v2664_v34, 1  ;;  %v512_v51 = vrot.slane %v2670_v37, 1  ;;  %v2686_v53 = vld [vmem:[%s2461_s22 + $0x110] sm:$0xff] }
  0x23   : > { %4370 = vst [vmem:[#allocation12_spill] sm:$0xff] %v2660_v27  ;;  %v2677_v42 = vsel %vm461_vm0, %v508_v21, %v510_v26  ;;  %v515_v45 = vrot.slane %v2667_v35, 1  ;;  %v2682_v50 = vsel %vm461_vm0, %v507_v29, %v508_v21  ;;  %v2689_v58 = vld [vmem:[%s2461_s22 + $0x118] sm:$0x3]  ;;  %v2692_v59 = vld [vmem:[%s2461_s22 + $0x108] sm:$0xff]  ;;  %v518_v6 = vrot.slane %v2686_v53, 1 }
  0x24   : > { %556 = vrot.lane.b32.xlu1 %v2545_v33, %s2402_s23  ;;  %4371 = vst [vmem:[#allocation13_spill] sm:$0xff] %v2677_v42  ;;  %4372 = vst [vmem:[#allocation14_spill] sm:$0xff] %v2682_v50  ;;  %v520_v8 = vrot.slane %v2689_v58, 1  ;;  %v2704_v13 = vsel %vm461_vm0, %v512_v51, %v513_v43  ;;  %v517_v21 = vrot.slane %v2692_v59, 1  ;;  %v2708_v26 = vld [vmem:[%s2461_s22 + $0x128] sm:$0xff] }
  0x25   : > { %554 = vrot.lane.b32.xlu0 %v2550_v36, %s2402_s23  ;;  %v2699_v61 = vsel %vm461_vm0, %v513_v43, %v515_v45  ;;  %4374 = vst [vmem:[#allocation16_spill] sm:$0xff] %v2704_v13  ;;  %4375 = vst [vmem:[#allocation17_spill] sm:$0xff] %v2708_v26  ;;  %v2711_v29 = vld [vmem:[%s2461_s22 + $0x130] sm:$0x3]  ;;  %v523_v43 = vrot.slane %v2708_v26, 1 }
  0x26   : > { %4373 = vst [vmem:[#allocation15_spill] sm:$0xff] %v2699_v61  ;;  %v2721_v45 = vsel %vm461_vm0, %v518_v6, %v520_v8  ;;  %v525_v51 = vrot.slane %v2711_v29, 1 }
  0x27   : > { %4377 = vst [vmem:[#allocation19_spill] sm:$0xff] %v2721_v45 }
  0x28   : > { %560 = vrot.lane.b32.xlu1 %v2567_v41, %s2402_s23  ;;  %v2743_v8 = vsel %vm461_vm0, %v523_v43, %v525_v51  ;;  %v2752_v41 = vld [vmem:[%s2461_s22 + $0x158] sm:$0xff] }
  0x29   : > { %558 = vrot.lane.b32.xlu0 %v2572_v44, %s2402_s23  ;;  %4381 = vst [vmem:[#allocation23_spill] sm:$0xff] %v2743_v8  ;;  %4383 = vst [vmem:[#allocation25_spill] sm:$0xff] %v2752_v41  ;;  %v2777_v44 = vld [vmem:[%s2461_s22 + $0x178] sm:$0x3] }
  0x2c   : > { %564 = vrot.lane.b32.xlu1 %v2589_v49, %s2402_s23 }
  0x2d   : > { %562 = vrot.lane.b32.xlu0 %v2594_v52, %s2402_s23 }
  0x30   : > { %568 = vrot.lane.b32.xlu1 %v2611_v57, %s2402_s23  ;;  %v2733_v57 = vld [vmem:[%s2461_s22 + $0x148] sm:$0x3] }
  0x31   : > { %566 = vrot.lane.b32.xlu0 %v2616_v60, %s2402_s23  ;;  %v2736_v60 = vld [vmem:[%s2461_s22 + $0x138] sm:$0xff] }
  0x32   : > { %4380 = vst [vmem:[#allocation22_spill] sm:$0xff] %v2736_v60  ;;  %v527_v52 = vrot.slane %v2736_v60, 1 }
  0x34   : > { %572 = vrot.lane.b32.xlu1 %v2633_v4, %s2402_s23 }
  0x35   : > { %570 = vrot.lane.b32.xlu0 %v2638_v9, %s2402_s23  ;;  %v2730_v9 = vld [vmem:[%s2461_s22 + $0x140] sm:$0xff] }
  0x36   : > { %4379 = vst [vmem:[#allocation21_spill] sm:$0xff] %v2730_v9 }
  0x38   : > { %576 = vrot.lane.b32.xlu1 %v2655_v20, %s2402_s23  ;;  %v2714_v20 = vld [vmem:[%s2461_s22 + $0x120] sm:$0xff] }
  0x39   : > { %574 = vrot.lane.b32.xlu0 %v2660_v27, %s2402_s23  ;;  %4376 = vst [vmem:[#allocation18_spill] sm:$0xff] %v2714_v20  ;;  %v2726_v27 = vsel %vm461_vm0, %v517_v21, %v518_v6  ;;  %v522_v4 = vrot.slane %v2714_v20, 1  ;;  %v528_v6 = vrot.slane %v2730_v9, 1  ;;  %v530_v21 = vrot.slane %v2733_v57, 1 }
  0x3a   : > { %4378 = vst [vmem:[#allocation20_spill] sm:$0xff] %v2726_v27 }
  0x3b   : > { %v2748_v49 = vsel %vm461_vm0, %v522_v4, %v523_v43  ;;  %v2765_v51 = vsel %vm461_vm0, %v528_v6, %v530_v21  ;;  %v533_v4 = vrot.slane %v2752_v41, 1 }
  0x3c   : > { %580 = vrot.lane.b32.xlu1 %v2677_v42, %s2402_s23  ;;  %4382 = vst [vmem:[#allocation24_spill] sm:$0xff] %v2748_v49  ;;  %4385 = vst [vmem:[#allocation27_spill] sm:$0xff] %v2765_v51  ;;  %v2774_v42 = vld [vmem:[%s2461_s22 + $0x170] sm:$0xff] }
  0x3d   : > { %578 = vrot.lane.b32.xlu0 %v2682_v50, %s2402_s23  ;;  %4387 = vst [vmem:[#allocation29_spill] sm:$0xff] %v2774_v42 }
  0x40   : > { %584 = vrot.lane.b32.xlu1 %v2699_v61, %s2402_s23  ;;  %v2770_v61 = vsel %vm461_vm0, %v527_v52, %v528_v6  ;;  %v538_v52 = vrot.slane %v2774_v42, 1  ;;  %v540_v6 = vrot.slane %v2777_v44, 1 }
  0x41   : > { %582 = vrot.lane.b32.xlu0 %v2704_v13, %s2402_s23  ;;  %4386 = vst [vmem:[#allocation28_spill] sm:$0xff] %v2770_v61 }
  0x44   : > { %588 = vrot.lane.b32.xlu1 %v2721_v45, %s2402_s23  ;;  %v2755_v45 = vld [vmem:[%s2461_s22 + $0x160] sm:$0x3] }
  0x45   : > { %586 = vrot.lane.b32.xlu0 %v2726_v27, %s2402_s23  ;;  %v2758_v27 = vld [vmem:[%s2461_s22 + $0x150] sm:$0xff]  ;;  %v535_v43 = vrot.slane %v2755_v45, 1 }
  0x46   : > { %4384 = vst [vmem:[#allocation26_spill] sm:$0xff] %v2758_v27  ;;  %v532_v13 = vrot.slane %v2758_v27, 1 }
  0x47   : > { %v2787_v21 = vsel %vm461_vm0, %v533_v4, %v535_v43  ;;  %v640_v43 = vrot.slane %v2475_v5, 2  ;;  %v647_v5 = vrot.slane %v2479_v7, 2  ;;  %v649_v7 = vrot.slane %v2497_v15, 2 }
  0x48   : > { %592 = vrot.lane.b32.xlu1 %v2743_v8, %s2402_s23  ;;  %v2780_v8 = vld [vmem:[%s2461_s22 + $0x168] sm:$0xff]  ;;  %4389 = vst [vmem:[#allocation31_spill] sm:$0xff] %v2787_v21 }
  0x49   : > { %590 = vrot.lane.b32.xlu0 %v2748_v49, %s2402_s23  ;;  %4388 = vst [vmem:[#allocation30_spill] sm:$0xff] %v2780_v8  ;;  %v2792_v49 = vsel %vm461_vm0, %v532_v13, %v533_v4  ;;  %v537_v50 = vrot.slane %v2780_v8, 1  ;;  %v639_v13 = vrot.slane %v2470_v2, 2 }
  0x4a   : > { %4390 = vst [vmem:[#allocation32_spill] sm:$0xff] %v2792_v49 }
  0x4b   : > { %v2805_v36 = vsel %vm461_vm0, %v537_v50, %v538_v52  ;;  %v644_v50 = vrot.slane %v2464_v0, 2 }
  0x4c   : > { %596 = vrot.lane.b32.xlu1 %v2765_v51, %s2402_s23  ;;  %v2800_v51 = vsel %vm461_vm0, %v538_v52, %v540_v6  ;;  %4392 = vst [vmem:[#allocation34_spill] sm:$0xff] %v2805_v36  ;;  %v645_v6 = vrot.slane %v2467_v1, 2  ;;  %v650_v52 = vrot.slane %v2487_v11, 2 }
  0x4d   : > { %594 = vrot.lane.b32.xlu0 %v2770_v61, %s2402_s23  ;;  %4391 = vst [vmem:[#allocation33_spill] sm:$0xff] %v2800_v51  ;;  %v642_v61 = vrot.slane %v2484_v10, 2  ;;  %v641_v10 = vsel %vm638_vm1, %v639_v13, %v640_v43  ;;  %v655_v13 = vrot.slane %v2511_v22, 2 }
  0x4e   : > { %v2820_v2 = vsel %vm638_vm1, %v645_v6, %v647_v5 }
  0x4f   : > { %v643_v4 = vsel %vm638_vm1, %v640_v43, %v642_v61  ;;  %v652_v61 = vrot.slane %v2494_v14, 2  ;;  %v2838_v14 = vsel %vm638_vm1, %v649_v7, %v650_v52  ;;  %v665_v7 = vrot.slane %v2554_v38, 2 }
  0x50   : > { %600 = vrot.lane.b32.xlu1 %v2787_v21, %s2402_s23  ;;  %v677_v21 = vrot.slane %v2601_v55, 2 }
  0x51   : > { %598 = vrot.lane.b32.xlu0 %v2792_v49, %s2402_s23  ;;  %v2833_v43 = vsel %vm638_vm1, %v650_v52, %v652_v61  ;;  %v659_v52 = vrot.slane %v2538_v32, 2  ;;  %v682_v49 = vrot.slane %v2623_v63, 2 }
  0x54   : > { %604 = vrot.lane.b32.xlu1 %v2800_v51, %s2402_s23  ;;  %v2825_v51 = vsel %vm638_vm1, %v644_v50, %v645_v6  ;;  %v654_v6 = vrot.slane %v2517_v24, 2  ;;  %v662_v50 = vrot.slane %v2535_v31, 2 }
  0x55   : > { %602 = vrot.lane.b32.xlu0 %v2805_v36, %s2402_s23  ;;  %v672_v36 = vrot.slane %v2579_v47, 2  ;;  %s2409_s23 = smov 32  }
  0x58   : > { %721 = vrot.lane.b32.xlu1 %v643_v4, %s2403_s24  ;;  %v657_v4 = vrot.slane %v2514_v23, 2  ;;  %v2851_v23 = vsel %vm638_vm1, %v654_v6, %v655_v13 }
  0x59   : > { %719 = vrot.lane.b32.xlu0 %v641_v10, %s2403_s24  ;;  %v660_v10 = vrot.slane %v2532_v30, 2 }
  0x5a   : > { %v2846_v5 = vsel %vm638_vm1, %v655_v13, %v657_v4  ;;  %v667_v4 = vrot.slane %v2557_v39, 2  ;;  %v664_v13 = vrot.slane %v2560_v40, 2 }
  0x5b   : > { %v2859_v61 = vsel %vm638_vm1, %v660_v10, %v662_v50  ;;  %v2864_v31 = vsel %vm638_vm1, %v659_v52, %v660_v10  ;;  %v670_v50 = vrot.slane %v2576_v46, 2  ;;  %v669_v10 = vrot.slane %v2582_v48, 2 }
  0x5c   : > { %725 = vrot.lane.b32.xlu1 %v2820_v2, %s2403_s24  ;;  %4393 = vst [vmem:[#allocation35_spill] sm:$0xff] %v2859_v61  ;;  %4394 = vst [vmem:[#allocation36_spill] sm:$0xff] %v2864_v31  ;;  %v2872_v6 = vsel %vm638_vm1, %v665_v7, %v667_v4  ;;  %v2877_v39 = vsel %vm638_vm1, %v664_v13, %v665_v7  ;;  %v675_v4 = vrot.slane %v2598_v54, 2  ;;  %v674_v7 = vrot.slane %v2604_v56, 2 }
  0x5d   : > { %723 = vrot.lane.b32.xlu0 %v2825_v51, %s2403_s24  ;;  %4395 = vst [vmem:[#allocation37_spill] sm:$0xff] %v2872_v6  ;;  %4396 = vst [vmem:[#allocation38_spill] sm:$0xff] %v2877_v39  ;;  %v2885_v52 = vsel %vm638_vm1, %v670_v50, %v672_v36  ;;  %v2890_v47 = vsel %vm638_vm1, %v669_v10, %v670_v50  ;;  %v680_v36 = vrot.slane %v2620_v62, 2  ;;  %v679_v50 = vrot.slane %v2626_v3, 2 }
  0x5e   : > { %4397 = vst [vmem:[#allocation39_spill] sm:$0xff] %v2885_v52  ;;  %4398 = vst [vmem:[#allocation40_spill] sm:$0xff] %v2890_v47  ;;  %v2898_v13 = vsel %vm638_vm1, %v675_v4, %v677_v21  ;;  %v2903_v55 = vsel %vm638_vm1, %v674_v7, %v675_v4  ;;  %v685_v21 = vrot.slane %v2642_v16, 2  ;;  %v684_v4 = vrot.slane %v2648_v19, 2 }
  0x5f   : > { %4399 = vst [vmem:[#allocation41_spill] sm:$0xff] %v2898_v13  ;;  %4400 = vst [vmem:[#allocation42_spill] sm:$0xff] %v2903_v55  ;;  %v2911_v10 = vsel %vm638_vm1, %v680_v36, %v682_v49  ;;  %v2916_v63 = vsel %vm638_vm1, %v679_v50, %v680_v36  ;;  %v690_v49 = vrot.slane %v2664_v34, 2  ;;  %v689_v36 = vrot.slane %v2670_v37, 2 }
  0x60   : > { %729 = vrot.lane.b32.xlu1 %v2833_v43, %s2403_s24  ;;  %4401 = vst [vmem:[#allocation43_spill] sm:$0xff] %v2911_v10  ;;  %4402 = vst [vmem:[#allocation44_spill] sm:$0xff] %v2916_v63 }
  0x61   : > { %727 = vrot.lane.b32.xlu0 %v2838_v14, %s2403_s24 }
  0x64   : > { %733 = vrot.lane.b32.xlu1 %v2846_v5, %s2403_s24 }
  0x65   : > { %731 = vrot.lane.b32.xlu0 %v2851_v23, %s2403_s24 }
  0x68   : > { %737 = vrot.lane.b32.xlu1 %v2859_v61, %s2403_s24 }
  0x69   : > { %735 = vrot.lane.b32.xlu0 %v2864_v31, %s2403_s24 }
  0x6c   : > { %741 = vrot.lane.b32.xlu1 %v2872_v6, %s2403_s24 }
  0x6d   : > { %739 = vrot.lane.b32.xlu0 %v2877_v39, %s2403_s24 }
  0x70   : > { %745 = vrot.lane.b32.xlu1 %v2885_v52, %s2403_s24  ;;  %v687_v52 = vrot.slane %v2645_v18, 2  ;;  %v2929_v18 = vsel %vm638_vm1, %v684_v4, %v685_v21 }
  0x71   : > { %743 = vrot.lane.b32.xlu0 %v2890_v47, %s2403_s24  ;;  %4404 = vst [vmem:[#allocation46_spill] sm:$0xff] %v2929_v18  ;;  %v712_v47 = vrot.slane %v2755_v45, 2  ;;  %v715_v45 = vrot.slane %v2774_v42, 2 }
  0x72   : > { %v2924_v7 = vsel %vm638_vm1, %v685_v21, %v687_v52  ;;  %v695_v52 = vrot.slane %v2686_v53, 2  ;;  %v694_v21 = vrot.slane %v2692_v59, 2 }
  0x73   : > { %4403 = vst [vmem:[#allocation45_spill] sm:$0xff] %v2924_v7 }
  0x74   : > { %749 = vrot.lane.b32.xlu1 %v2898_v13, %s2403_s24  ;;  %v692_v13 = vrot.slane %v2667_v35, 2  ;;  %v2942_v35 = vsel %vm638_vm1, %v689_v36, %v690_v49 }
  0x75   : > { %747 = vrot.lane.b32.xlu0 %v2903_v55, %s2403_s24  ;;  %v707_v55 = vrot.slane %v2733_v57, 2 }
  0x76   : > { %v2937_v50 = vsel %vm638_vm1, %v690_v49, %v692_v13  ;;  %v700_v13 = vrot.slane %v2708_v26, 2  ;;  %v699_v49 = vrot.slane %v2714_v20, 2 }
  0x78   : > { %753 = vrot.lane.b32.xlu1 %v2911_v10, %s2403_s24  ;;  %v697_v10 = vrot.slane %v2689_v58, 2  ;;  %v2955_v58 = vsel %vm638_vm1, %v694_v21, %v695_v52 }
  0x79   : > { %751 = vrot.lane.b32.xlu0 %v2916_v63, %s2403_s24  ;;  %v702_v63 = vrot.slane %v2711_v29, 2  ;;  %v2968_v29 = vsel %vm638_vm1, %v699_v49, %v700_v13 }
  0x7a   : > { %v2950_v4 = vsel %vm638_vm1, %v695_v52, %v697_v10  ;;  %v705_v10 = vrot.slane %v2730_v9, 2  ;;  %4406 = vst [vmem:[#allocation48_spill] sm:$0xff] %v2968_v29  ;;  %v704_v52 = vrot.slane %v2736_v60, 2 }
  0x7b   : > { %v2963_v36 = vsel %vm638_vm1, %v700_v13, %v702_v63  ;;  %v710_v63 = vrot.slane %v2752_v41, 2  ;;  %v709_v13 = vrot.slane %v2758_v27, 2 }
  0x7c   : > { %757 = vrot.lane.b32.xlu1 %v2924_v7, %s2403_s24  ;;  %4405 = vst [vmem:[#allocation47_spill] sm:$0xff] %v2963_v36  ;;  %v2976_v21 = vsel %vm638_vm1, %v705_v10, %v707_v55  ;;  %v2983_v57 = vsel %vm638_vm1, %v704_v52, %v705_v10  ;;  %v714_v52 = vrot.slane %v2780_v8, 2 }
  0x7d   : > { %755 = vrot.lane.b32.xlu0 %v2929_v18, %s2403_s24  ;;  %4407 = vst [vmem:[#allocation49_spill] sm:$0xff] %v2976_v21  ;;  %4409 = vst [vmem:[#allocation51_spill] sm:$0xff] %v2983_v57  ;;  %v2993_v55 = vsel %vm638_vm1, %v710_v63, %v712_v47  ;;  %v3000_v10 = vsel %vm638_vm1, %v709_v13, %v710_v63 }
  0x7e   : > { %4411 = vst [vmem:[#allocation53_spill] sm:$0xff] %v2993_v55  ;;  %4413 = vst [vmem:[#allocation55_spill] sm:$0xff] %v3000_v10 }
  0x80   : > { %761 = vrot.lane.b32.xlu1 %v2937_v50, %s2403_s24 }
  0x81   : > { %759 = vrot.lane.b32.xlu0 %v2942_v35, %s2403_s24 }
  0x84   : > { %765 = vrot.lane.b32.xlu1 %v2950_v4, %s2403_s24 }
  0x85   : > { %763 = vrot.lane.b32.xlu0 %v2955_v58, %s2403_s24 }
  0x88   : > { %769 = vrot.lane.b32.xlu1 %v2963_v36, %s2403_s24 }
  0x89   : > { %767 = vrot.lane.b32.xlu0 %v2968_v29, %s2403_s24 }
  0x8a   : > { %v2980_v6 = vpop.permute.xlu1 %546 }
  0x8b   : > { %4408 = vst [vmem:[#allocation50_spill] sm:$0xff] %v2980_v6  ;;  %v2986_v49 = vpop.permute.xlu0 %542  ;;  %v717_v6 = vrot.slane %v2777_v44, 2  ;;  %v3015_v44 = vsel %vm638_vm1, %v714_v52, %v715_v45 }
  0x8c   : > { %4410 = vst [vmem:[#allocation52_spill] sm:$0xff] %v2986_v49  ;;  %773 = vrot.lane.b32.xlu1 %v2976_v21, %s2403_s24  ;;  %4416 = vst [vmem:[#allocation58_spill] sm:$0xff] %v3015_v44 }
  0x8d   : > { %771 = vrot.lane.b32.xlu0 %v2983_v57, %s2403_s24  ;;  %v3010_v47 = vsel %vm638_vm1, %v715_v45, %v717_v6 }
  0x8e   : > { %v2997_v39 = vpop.permute.xlu1 %548  ;;  %4415 = vst [vmem:[#allocation57_spill] sm:$0xff] %v3010_v47 }
  0x8f   : > { %4412 = vst [vmem:[#allocation54_spill] sm:$0xff] %v2997_v39  ;;  %v3003_v49 = vpop.permute.xlu0 %544 }
  0x90   : > { %4414 = vst [vmem:[#allocation56_spill] sm:$0xff] %v3003_v49  ;;  %777 = vrot.lane.b32.xlu1 %v2993_v55, %s2403_s24 }
  0x91   : > { %775 = vrot.lane.b32.xlu0 %v3000_v10, %s2403_s24 }
  0x92   : > { %v3012_v21 = vpop.permute.xlu1 %552 }
  0x93   : > { %v3017_v63 = vpop.permute.xlu0 %550 }
  0x94   : > { %781 = vrot.lane.b32.xlu1 %v3010_v47, %s2403_s24 }
  0x95   : > { %779 = vrot.lane.b32.xlu0 %v3015_v44, %s2403_s24 }
  0x96   : > { %v3023_v13 = vpop.permute.xlu1 %556 }
  0x97   : > { %v3025_v55 = vpop.permute.xlu0 %554 }
  0x98   : > { %819 = vrot.lane.b32.xlu1 %v2467_v1, %s2404_s25 }
  0x99   : > { %817 = vrot.lane.b32.xlu0 %v2464_v0, %s2404_s25 }
  0x9a   : > { %v3031_v6 = vpop.permute.xlu1 %560 }
  0x9b   : > { %v3033_v45 = vpop.permute.xlu0 %558 }
  0x9c   : > { %823 = vrot.lane.b32.xlu1 %v2487_v11, %s2404_s25 }
  0x9d   : > { %821 = vrot.lane.b32.xlu0 %v2497_v15, %s2404_s25 }
  0x9e   : > { %v3039_v52 = vpop.permute.xlu1 %564 }
  0x9f   : > { %v3041_v47 = vpop.permute.xlu0 %562 }
  0xa0   : > { %827 = vrot.lane.b32.xlu1 %v2511_v22, %s2404_s25 }
  0xa1   : > { %825 = vrot.lane.b32.xlu0 %v2517_v24, %s2404_s25 }
  0xa2   : > { %v3047_v0 = vpop.permute.xlu1 %568 }
  0xa3   : > { %v3049_v1 = vpop.permute.xlu0 %566 }
  0xa4   : > { %831 = vrot.lane.b32.xlu1 %v2532_v30, %s2404_s25 }
  0xa5   : > { %829 = vrot.lane.b32.xlu0 %v2538_v32, %s2404_s25 }
  0xa6   : > { %v3055_v44 = vpop.permute.xlu1 %572 }
  0xa7   : > { %v3057_v10 = vpop.permute.xlu0 %570 }
  0xa8   : > { %835 = vrot.lane.b32.xlu1 %v2554_v38, %s2404_s25 }
  0xa9   : > { %833 = vrot.lane.b32.xlu0 %v2560_v40, %s2404_s25 }
  0xaa   : > { %v3063_v39 = vpop.permute.xlu1 %576 }
  0xab   : > { %4417 = vst [vmem:[#allocation59_spill] sm:$0xff] %v3063_v39  ;;  %v3065_v49 = vpop.permute.xlu0 %574 }
  0xac   : > { %4418 = vst [vmem:[#allocation60_spill] sm:$0xff] %v3065_v49  ;;  %839 = vrot.lane.b32.xlu1 %v2576_v46, %s2404_s25 }
  0xad   : > { %837 = vrot.lane.b32.xlu0 %v2582_v48, %s2404_s25 }
  0xae   : > { %v3071_v57 = vpop.permute.xlu1 %580 }
  0xaf   : > { %4419 = vst [vmem:[#allocation61_spill] sm:$0xff] %v3071_v57  ;;  %v3073_v61 = vpop.permute.xlu0 %578 }
  0xb0   : > { %4420 = vst [vmem:[#allocation62_spill] sm:$0xff] %v3073_v61  ;;  %843 = vrot.lane.b32.xlu1 %v2598_v54, %s2404_s25 }
  0xb1   : > { %841 = vrot.lane.b32.xlu0 %v2604_v56, %s2404_s25 }
  0xb2   : > { %v3079_v36 = vpop.permute.xlu1 %584 }
  0xb3   : > { %v3081_v39 = vpop.permute.xlu0 %582 }
  0xb4   : > { %847 = vrot.lane.b32.xlu1 %v2620_v62, %s2404_s25 }
  0xb5   : > { %845 = vrot.lane.b32.xlu0 %v2626_v3, %s2404_s25 }
  0xb6   : > { %v3087_v49 = vpop.permute.xlu1 %588 }
  0xb7   : > { %v3089_v57 = vpop.permute.xlu0 %586 }
  0xb8   : > { %4421 = vst [vmem:[#allocation63_spill] sm:$0xff] %v3089_v57  ;;  %851 = vrot.lane.b32.xlu1 %v2642_v16, %s2404_s25 }
  0xb9   : > { %849 = vrot.lane.b32.xlu0 %v2648_v19, %s2404_s25 }
  0xba   : > { %v3095_v61 = vpop.permute.xlu1 %592 }
  0xbb   : > { %4422 = vst [vmem:[#allocation64_spill] sm:$0xff] %v3095_v61  ;;  %v3097_v31 = vpop.permute.xlu0 %590 }
  0xbc   : > { %4423 = vst [vmem:[#allocation65_spill] sm:$0xff] %v3097_v31  ;;  %855 = vrot.lane.b32.xlu1 %v2664_v34, %s2404_s25 }
  0xbd   : > { %853 = vrot.lane.b32.xlu0 %v2670_v37, %s2404_s25 }
  0xbe   : > { %v3103_v62 = vpop.permute.xlu1 %596 }
  0xbf   : > { %4424 = vst [vmem:[#allocation66_spill] sm:$0xff] %v3103_v62  ;;  %v3105_v3 = vpop.permute.xlu0 %594 }
  0xc0   : > { %4425 = vst [vmem:[#allocation67_spill] sm:$0xff] %v3105_v3  ;;  %859 = vrot.lane.b32.xlu1 %v2686_v53, %s2404_s25 }
  0xc1   : > { %857 = vrot.lane.b32.xlu0 %v2692_v59, %s2404_s25 }
  0xc2   : > { %v3111_v16 = vpop.permute.xlu1 %600 }
  0xc3   : > { %4426 = vst [vmem:[#allocation68_spill] sm:$0xff] %v3111_v16  ;;  %v3113_v19 = vpop.permute.xlu0 %598 }
  0xc4   : > { %4427 = vst [vmem:[#allocation69_spill] sm:$0xff] %v3113_v19  ;;  %863 = vrot.lane.b32.xlu1 %v2708_v26, %s2404_s25  ;;  %v4439_v26 = vld [vmem:[#allocation13_spill] sm:$0xff] }
  0xc5   : > { %861 = vrot.lane.b32.xlu0 %v2714_v20, %s2404_s25 }
  0xc6   : > { %v3119_v29 = vpop.permute.xlu1 %604 }
  0xc7   : > { %4428 = vst [vmem:[#allocation70_spill] sm:$0xff] %v3119_v29  ;;  %v3121_v62 = vpop.permute.xlu0 %602 }
  0xc8   : > { %4429 = vst [vmem:[#allocation71_spill] sm:$0xff] %v3121_v62  ;;  %867 = vrot.lane.b32.xlu1 %v2730_v9, %s2404_s25  ;;  %v4438_v9 = vld [vmem:[#allocation4_spill] sm:$0xff] }
  0xc9   : > { %865 = vrot.lane.b32.xlu0 %v2736_v60, %s2404_s25  ;;  %v4437_v60 = vld [vmem:[#allocation14_spill] sm:$0xff] }
  0xca   : > { %v3127_v3 = vpop.permute.xlu1 %721 }
  0xcb   : > { %4430 = vst [vmem:[#allocation72_spill] sm:$0xff] %v3127_v3  ;;  %v3129_v16 = vpop.permute.xlu0 %719 }
  0xcc   : > { %4431 = vst [vmem:[#allocation73_spill] sm:$0xff] %v3129_v16  ;;  %871 = vrot.lane.b32.xlu1 %v2752_v41, %s2404_s25  ;;  %v3151_v16 = vld [vmem:[%s3142_s29 + $0x8] sm:$0xff] }
  0xcd   : > { %869 = vrot.lane.b32.xlu0 %v2758_v27, %s2404_s25  ;;  %4434 = vst [vmem:[#allocation76_spill] sm:$0xff] %v3151_v16 }
  0xce   : > { %v3137_v29 = vpop.permute.xlu1 %725 }
  0xcf   : > { %4432 = vst [vmem:[#allocation74_spill] sm:$0xff] %v3137_v29  ;;  %v3144_v3 = vpop.permute.xlu0 %723  ;;  %v3156_v29 = vld [vmem:[%s3142_s29] sm:$0xff] }
  0xd0   : > { %4433 = vst [vmem:[#allocation75_spill] sm:$0xff] %v3144_v3  ;;  %875 = vrot.lane.b32.xlu1 %v2774_v42, %s2404_s25  ;;  %4435 = vst [vmem:[#allocation77_spill] sm:$0xff] %v3156_v29 }
  0xd1   : > { %873 = vrot.lane.b32.xlu0 %v2780_v8, %s2404_s25 }
  0xd2   : > { %v3153_v62 = vpop.permute.xlu1 %729 }
  0xd3   : > { %v3158_v27 = vpop.permute.xlu0 %727 }
  0xd4   : > { %879 = vrot.lane.b32.xlu1 %v3151_v16, %s2404_s25 }
  0xd5   : > { %877 = vrot.lane.b32.xlu0 %v3156_v29, %s2404_s25 }
  0xd6   : > { %v3164_v3 = vpop.permute.xlu1 %733 }
  0xd7   : > { %v3166_v42 = vpop.permute.xlu0 %731 }
  0xd8   : > { %921 = vrot.lane.b32.xlu1 %v2504_v17, %s2405_s30  ;;  %v4436_v17 = vld [vmem:[#allocation2_spill] sm:$0xff] }
  0xd9   : > { %919 = vrot.lane.b32.xlu0 %v2490_v12, %s2405_s30 }
  0xda   : > { %v3172_v8 = vpop.permute.xlu1 %737 }
  0xdb   : > { %v3174_v19 = vpop.permute.xlu0 %735 }
  0xdc   : > { %925 = vrot.lane.b32.xlu1 %v2523_v25, %s2405_s30 }
  0xdd   : > { %923 = vrot.lane.b32.xlu0 %v2528_v28, %s2405_s30 }
  0xde   : > { %v3180_v16 = vpop.permute.xlu1 %741 }
  0xdf   : > { %v3182_v29 = vpop.permute.xlu0 %739 }
  0xe0   : > { %929 = vrot.lane.b32.xlu1 %v2545_v33, %s2405_s30 }
  0xe1   : > { %927 = vrot.lane.b32.xlu0 %v4436_v17, %s2405_s30 }
  0xe2   : > { %v3188_v12 = vpop.permute.xlu1 %745 }
  0xe3   : > { %v3190_v41 = vpop.permute.xlu0 %743 }
  0xe4   : > { %951 = vrot.lane.b32.xlu1 %v4437_v60, %s2405_s30 }
  0xe5   : > { %931 = vrot.lane.b32.xlu0 %v4438_v9, %s2405_s30 }
  0xe6   : > { %v3196_v20 = vpop.permute.xlu1 %749 }
  0xe7   : > { %v3198_v31 = vpop.permute.xlu0 %747 }
  0xe8   : > { %1020 = vrot.lane.b32.xlu1 %v2825_v51, %s2406_s5 }
  0xe9   : > { %953 = vrot.lane.b32.xlu0 %v4439_v26, %s2405_s30 }
  0xea   : > { %v3204_v61 = vpop.permute.xlu1 %753 }
  0xeb   : > { %4440 = vst [vmem:[#allocation2_spill] sm:$0xff] %v3204_v61  ;;  %v3206_v57 = vpop.permute.xlu0 %751  ;;  %v1683_v61 = vld [vmem:[%s4253_s2 + $0x10] sm:$0xff] }
  0xec   : > { %4441 = vst [vmem:[#allocation78_spill] sm:$0xff] %v3206_v57  ;;  %1022 = vrot.lane.b32.xlu1 %v2820_v2, %s2406_s5  ;;  %v1681_v2 = vld [vmem:[%s4253_s2] sm:$0xff]  ;;  %v1684_v57 = vld [vmem:[%s4253_s2 + $0x18] sm:$0xff] }
  0xed   : > { %1052 = vrot.lane.b32.xlu0 %v2929_v18, %s2406_s5  ;;  %v1682_v18 = vld [vmem:[%s4253_s2 + $0x8] sm:$0xff] }
  0xee   : > { %v3212_v60 = vpop.permute.xlu1 %757 }
  0xef   : > { %4442 = vst [vmem:[#allocation79_spill] sm:$0xff] %v3212_v60  ;;  %v3214_v9 = vpop.permute.xlu0 %755  ;;  %v2311_v60 = vpack.c.bf16 %v1682_v18, %v1681_v2  ;;  %v2315_v18 = vpack.c.bf16 %v1684_v57, %v1683_v61  ;;  %v4449_v57 = vld [vmem:[#allocation15_spill] sm:$0xff] }
  0xf0   : > { %4443 = vst [vmem:[#allocation80_spill] sm:$0xff] %v3214_v9  ;;  %1118 = vrot.lane.b32.xlu1 %v2497_v15, %s2407_s6 }
  0xf1   : > { %1054 = vrot.lane.b32.xlu0 %v2924_v7, %s2406_s5  ;;  %2312 = vmatprep.subr.bf16.mxu0 %v2311_v60 }
  0xf2   : > { %v3220_v51 = vpop.permute.xlu1 %761  ;;  %2319 = vmatprep.subr.bf16.mxu1 %v2311_v60  ;;  %2314 = vmatpush3.bf16.msra.mxu0 %v2311_v60 }
  0xf3   : > { %v3222_v26 = vpop.permute.xlu0 %759  ;;  %2322 = vmatpush3.bf16.msra.mxu1 %v2311_v60  ;;  %2316 = vmatprep.subr.bf16.mxu0 %v2315_v18 }
  0xf4   : > { %1120 = vrot.lane.b32.xlu1 %v2487_v11, %s2407_s6  ;;  %2320 = vmatprep.subr.bf16.mxu1 %v2315_v18 }
  0xf5   : > { %1150 = vrot.lane.b32.xlu0 %v2670_v37, %s2407_s6 }
  0xf6   : > { %v3234_v7 = vpop.permute.xlu1 %765  ;;  %2318 = vmatpush3.bf16.msra.mxu0 %v2315_v18 }
  0xf7   : > { %4444 = vst [vmem:[#allocation81_spill] sm:$0xff] %v3234_v7  ;;  %v3236_v9 = vpop.permute.xlu0 %763  ;;  %v1685_v7 = vld [vmem:[%s4253_s2 + $0x20] sm:$0xf]  ;;  %2323 = vmatpush3.bf16.msra.mxu1 %v2315_v18 }
  0xf8   : > { %4445 = vst [vmem:[#allocation82_spill] sm:$0xff] %v3236_v9  ;;  %1220 = vrot.lane.b32.xlu1 %v2528_v28, %s2408_s11  ;;  %v4447_v28 = vld [vmem:[#allocation16_spill] sm:$0xff]  ;;  %2261 = vmatprep.subr.msk.mxu0 %vm1790_vm2, %v1685_v7 }
  0xf9   : > { %1152 = vrot.lane.b32.xlu0 %v2664_v34, %s2407_s6  ;;  %2321 = vmatprep.subr.msk.mxu1 %vm1790_vm2, %v1685_v7 }
  0xfa   : > { %v3248_v2 = vpop.permute.xlu1 %769  ;;  %2262 = vmatpush3.msk.msra.mxu0 %vm1790_vm2, %v1685_v7 }
  0xfb   : > { %v3250_v9 = vpop.permute.xlu0 %767  ;;  %2324 = vmatpush3.msk.msra.mxu1 %vm1790_vm2, %v1685_v7 }
  0xfc   : > { %4446 = vst [vmem:[#allocation83_spill] sm:$0xff] %v3250_v9  ;;  %955 = vrot.lane.b32.xlu1 %v4447_v28, %s2405_s30 }
  0xfd   : > { %1252 = vrot.lane.b32.xlu0 %v4447_v28, %s2408_s11 }
  0xfe   : > { %v3259_v60 = vpop.permute.xlu1 %773 }
  0xff   : > { %v3261_v61 = vpop.permute.xlu0 %771 }
 0x100   : > { %4448 = vst [vmem:[#allocation16_spill] sm:$0xff] %v3261_v61  ;;  %1254 = vrot.lane.b32.xlu1 %v4449_v57, %s2408_s11 }
 0x101   : > { %1222 = vrot.lane.b32.xlu0 %v2523_v25, %s2408_s11 }
 0x102   : > { %v3267_v28 = vpop.permute.xlu1 %777 }
 0x103   : > { %v3269_v9 = vpop.permute.xlu0 %775 }
 0x104   : > { %4450 = vst [vmem:[#allocation15_spill] sm:$0xff] %v3269_v9  ;;  %1353 = vrot.lane.b32.xlu1 %v2942_v35, %s2409_s23 }
 0x105   : > { %1321 = vrot.lane.b32.xlu0 %v2838_v14, %s2409_s23 }
 0x106   : > { %v3275_v18 = vpop.permute.xlu1 %781 }
 0x107   : > { %4451 = vst [vmem:[#allocation84_spill] sm:$0xff] %v3275_v18  ;;  %v3277_v61 = vpop.permute.xlu0 %779 }
 0x108   : > { %1024 = vrot.lane.b32.xlu1 %v2838_v14, %s2406_s5  ;;  %v1423_v14 = vsel %vm1417_vm3, %v2487_v11, %v3012_v21 }
 0x109   : > { %957 = vrot.lane.b32.xlu0 %v4449_v57, %s2405_s30  ;;  %v1456_v57 = vsel %vm1450_vm4, %v1423_v14, %v3153_v62 }
 0x10a   : > { %v3283_v25 = vpop.permute.xlu1 %819 }
 0x10b   : > { %v3285_v7 = vpop.permute.xlu0 %817 }
 0x10c   : > { %1323 = vrot.lane.b32.xlu1 %v2833_v43, %s2409_s23 }
 0x10d   : > { %1056 = vrot.lane.b32.xlu0 %v2942_v35, %s2406_s5  ;;  %v1422_v35 = vsel %vm1417_vm3, %v2497_v15, %v3017_v63  ;;  %v1425_v15 = vsel %vm1417_vm3, %v2511_v22, %v3023_v13 }
 0x10e   : > { %v3291_v9 = vpop.permute.xlu1 %823 }
 0x10f   : > { %4452 = vst [vmem:[#allocation85_spill] sm:$0xff] %v3291_v9  ;;  %v3293_v18 = vpop.permute.xlu0 %821 }
 0x110   : > { %4453 = vst [vmem:[#allocation86_spill] sm:$0xff] %v3293_v18  ;;  %1026 = vrot.lane.b32.xlu1 %v2833_v43, %s2406_s5  ;;  %v1455_v43 = vsel %vm1450_vm4, %v1422_v35, %v3158_v27  ;;  %v1424_v27 = vsel %vm1417_vm3, %v2517_v24, %v3025_v55 }
 0x111   : > { %1355 = vrot.lane.b32.xlu0 %v2937_v50, %s2409_s23  ;;  %v1457_v62 = vsel %vm1450_vm4, %v1424_v27, %v3166_v42  ;;  %v1426_v42 = vsel %vm1417_vm3, %v2538_v32, %v3033_v45  ;;  %v1429_v45 = vsel %vm1417_vm3, %v2554_v38, %v3039_v52  ;;  %v4454_v52 = vld [vmem:[#allocation20_spill] sm:$0xff] }
 0x112   : > { %v828_v9 = vpop.permute.xlu1 %827 }
 0x113   : > { %v3310_v18 = vsel %vm1483_vm5, %v1456_v57, %v828_v9  ;;  %v826_v11 = vpop.permute.xlu0 %825  ;;  %v1458_v9 = vsel %vm1450_vm4, %v1425_v15, %v3164_v3  ;;  %v1459_v3 = vsel %vm1450_vm4, %v1426_v42, %v3174_v19  ;;  %v1462_v19 = vsel %vm1450_vm4, %v1429_v45, %v3180_v16 }
 0x114   : > { %v3313_v21 = vsel %vm1483_vm5, %v1455_v43, %v826_v11  ;;  %1122 = vrot.lane.b32.xlu1 %v2517_v24, %s2407_s6  ;;  %v1427_v24 = vsel %vm1417_vm3, %v2532_v30, %v3031_v6 }
 0x115   : > { %1058 = vrot.lane.b32.xlu0 %v2937_v50, %s2406_s5  ;;  %v1460_v50 = vsel %vm1450_vm4, %v1427_v24, %v3172_v8  ;;  %v1428_v8 = vsel %vm1417_vm3, %v2560_v40, %v3041_v47  ;;  %v1431_v40 = vsel %vm1417_vm3, %v2576_v46, %v3047_v0  ;;  %v4455_v0 = vld [vmem:[#allocation19_spill] sm:$0xff] }
 0x116   : > { %v832_v63 = vpop.permute.xlu1 %831  ;;  %v1461_v11 = vsel %vm1450_vm4, %v1428_v8, %v3182_v29  ;;  %v1430_v29 = vsel %vm1417_vm3, %v2582_v48, %v3049_v1  ;;  %v1464_v47 = vsel %vm1450_vm4, %v1431_v40, %v3188_v12  ;;  %v1433_v48 = vsel %vm1417_vm3, %v2598_v54, %v3055_v44 }
 0x117   : > { %v3330_v14 = vsel %vm1483_vm5, %v1458_v9, %v832_v63  ;;  %v830_v35 = vpop.permute.xlu0 %829  ;;  %v1463_v27 = vsel %vm1450_vm4, %v1430_v29, %v3190_v41  ;;  %v1432_v41 = vsel %vm1417_vm3, %v2604_v56, %v3057_v10  ;;  %v1466_v1 = vsel %vm1450_vm4, %v1433_v48, %v3196_v20  ;;  %v4463_v29 = vld [vmem:[#allocation83_spill] sm:$0xff]  ;;  %v4467_v48 = vld [vmem:[#allocation22_spill] sm:$0xff] }
 0x118   : > { %v3333_v13 = vsel %vm1483_vm5, %v1457_v62, %v830_v35  ;;  %1124 = vrot.lane.b32.xlu1 %v2511_v22, %s2407_s6  ;;  %v1465_v62 = vsel %vm1450_vm4, %v1432_v41, %v3198_v31  ;;  %v1439_v10 = vsel %vm1417_vm3, %v2664_v34, %v3079_v36 }
 0x119   : > { %1154 = vrot.lane.b32.xlu0 %v2692_v59, %s2407_s6  ;;  %v1472_v44 = vsel %vm1450_vm4, %v1439_v10, %v3220_v51 }
 0x11a   : > { %v836_v55 = vpop.permute.xlu1 %835 }
 0x11b   : > { %v3350_v22 = vsel %vm1483_vm5, %v1460_v50, %v836_v55  ;;  %v834_v57 = vpop.permute.xlu0 %833 }
 0x11c   : > { %v3353_v6 = vsel %vm1483_vm5, %v1459_v3, %v834_v57  ;;  %1224 = vrot.lane.b32.xlu1 %v4436_v17, %s2408_s11  ;;  %v4458_v57 = vld [vmem:[#allocation82_spill] sm:$0xff] }
 0x11d   : > { %1156 = vrot.lane.b32.xlu0 %v2686_v53, %s2407_s6 }
 0x11e   : > { %v840_v43 = vpop.permute.xlu1 %839 }
 0x11f   : > { %v3370_v17 = vsel %vm1483_vm5, %v1462_v19, %v840_v43  ;;  %v838_v15 = vpop.permute.xlu0 %837  ;;  %v4460_v19 = vld [vmem:[#allocation17_spill] sm:$0xff] }
 0x120   : > { %v3373_v38 = vsel %vm1483_vm5, %v1461_v11, %v838_v15  ;;  %959 = vrot.lane.b32.xlu1 %v4454_v52, %s2405_s30  ;;  %v4461_v43 = vld [vmem:[#allocation65_spill] sm:$0xff]  ;;  %v4462_v11 = vld [vmem:[#allocation18_spill] sm:$0xff] }
 0x121   : > { %1256 = vrot.lane.b32.xlu0 %v4454_v52, %s2408_s11  ;;  %v1442_v15 = vsel %vm1417_vm3, %v4462_v11, %v4461_v43 }
 0x122   : > { %v844_v16 = vpop.permute.xlu1 %843 }
 0x123   : > { %v3390_v9 = vsel %vm1483_vm5, %v1464_v47, %v844_v16  ;;  %v842_v63 = vpop.permute.xlu0 %841  ;;  %v1475_v47 = vsel %vm1450_vm4, %v1442_v15, %v4463_v29 }
 0x124   : > { %v3393_v46 = vsel %vm1483_vm5, %v1463_v27, %v842_v63  ;;  %1258 = vrot.lane.b32.xlu1 %v4455_v0, %s2408_s11  ;;  %v4465_v63 = vld [vmem:[#allocation21_spill] sm:$0xff] }
 0x125   : > { %1226 = vrot.lane.b32.xlu0 %v2545_v33, %s2408_s11 }
 0x126   : > { %v848_v12 = vpop.permute.xlu1 %847 }
 0x127   : > { %v3410_v35 = vsel %vm1483_vm5, %v1466_v1, %v848_v12  ;;  %v846_v24 = vpop.permute.xlu0 %845 }
 0x128   : > { %v3413_v54 = vsel %vm1483_vm5, %v1465_v62, %v846_v24  ;;  %1357 = vrot.lane.b32.xlu1 %v2955_v58, %s2409_s23  ;;  %v4468_v62 = vld [vmem:[#allocation16_spill] sm:$0xff] }
 0x129   : > { %1325 = vrot.lane.b32.xlu0 %v2851_v23, %s2409_s23 }
 0x12a   : > { %v3419_v33 = vpop.permute.xlu1 %851 }
 0x12b   : > { %v3421_v56 = vpop.permute.xlu0 %849 }
 0x12c   : > { %1028 = vrot.lane.b32.xlu1 %v2851_v23, %s2406_s5  ;;  %v1438_v23 = vsel %vm1417_vm3, %v2670_v37, %v3081_v39  ;;  %v1441_v37 = vsel %vm1417_vm3, %v2686_v53, %v3087_v49  ;;  %v4456_v39 = vld [vmem:[#allocation63_spill] sm:$0xff]  ;;  %v4459_v49 = vld [vmem:[#allocation64_spill] sm:$0xff] }
 0x12d   : > { %961 = vrot.lane.b32.xlu0 %v4455_v0, %s2405_s30  ;;  %v1471_v50 = vsel %vm1450_vm4, %v1438_v23, %v3222_v26  ;;  %v1440_v26 = vsel %vm1417_vm3, %v2692_v59, %v4456_v39  ;;  %v1443_v59 = vsel %vm1417_vm3, %v4460_v19, %v4459_v49  ;;  %v4475_v49 = vld [vmem:[#allocation24_spill] sm:$0xff] }
 0x12e   : > { %v3427_v20 = vpop.permute.xlu1 %855  ;;  %v1473_v45 = vsel %vm1450_vm4, %v1440_v26, %v4458_v57  ;;  %v1476_v52 = vsel %vm1450_vm4, %v1443_v59, %v3248_v2  ;;  %v4466_v2 = vld [vmem:[#allocation67_spill] sm:$0xff]  ;;  %v4477_v59 = vld [vmem:[#allocation29_spill] sm:$0xff] }
 0x12f   : > { %v3429_v31 = vpop.permute.xlu0 %853  ;;  %v1444_v41 = vsel %vm1417_vm3, %v4467_v48, %v4466_v2  ;;  %v4481_v2 = vld [vmem:[#allocation23_spill] sm:$0xff] }
 0x130   : > { %1327 = vrot.lane.b32.xlu1 %v2846_v5, %s2409_s23  ;;  %v1477_v24 = vsel %vm1450_vm4, %v1444_v41, %v4468_v62  ;;  %v4482_v41 = vld [vmem:[#allocation3_spill] sm:$0xff]  ;;  %v4483_v62 = vld [vmem:[#allocation48_spill] sm:$0xff] }
 0x131   : > { %1060 = vrot.lane.b32.xlu0 %v2955_v58, %s2406_s5  ;;  %v4457_v58 = vld [vmem:[#allocation81_spill] sm:$0xff] }
 0x132   : > { %v860_v42 = vpop.permute.xlu1 %859  ;;  %v1474_v36 = vsel %vm1450_vm4, %v1441_v37, %v4457_v58  ;;  %v4473_v37 = vld [vmem:[#allocation26_spill] sm:$0xff] }
 0x133   : > { %v3446_v55 = vsel %vm1483_vm5, %v1472_v44, %v860_v42  ;;  %v858_v3 = vpop.permute.xlu0 %857  ;;  %v4469_v44 = vld [vmem:[#allocation4_spill] sm:$0xff] }
 0x134   : > { %v3449_v34 = vsel %vm1483_vm5, %v1471_v50, %v858_v3  ;;  %1030 = vrot.lane.b32.xlu1 %v2846_v5, %s2406_s5  ;;  %v4470_v42 = vld [vmem:[#allocation68_spill] sm:$0xff]  ;;  %v4471_v50 = vld [vmem:[#allocation25_spill] sm:$0xff] }
 0x135   : > { %1359 = vrot.lane.b32.xlu0 %v2950_v4, %s2409_s23  ;;  %v1447_v3 = vsel %vm1417_vm3, %v4471_v50, %v4470_v42 }
 0x136   : > { %v864_v51 = vpop.permute.xlu1 %863  ;;  %v1480_v26 = vsel %vm1450_vm4, %v1447_v3, %v3267_v28  ;;  %v4478_v28 = vld [vmem:[#allocation71_spill] sm:$0xff] }
 0x137   : > { %v3466_v5 = vsel %vm1483_vm5, %v1474_v36, %v864_v51  ;;  %v862_v8 = vpop.permute.xlu0 %861  ;;  %v4474_v36 = vld [vmem:[#allocation15_spill] sm:$0xff] }
 0x138   : > { %v3469_v53 = vsel %vm1483_vm5, %v1473_v45, %v862_v8  ;;  %1126 = vrot.lane.b32.xlu1 %v2538_v32, %s2407_s6 }
 0x139   : > { %1062 = vrot.lane.b32.xlu0 %v2950_v4, %s2406_s5  ;;  %v4464_v4 = vld [vmem:[#allocation66_spill] sm:$0xff] }
 0x13a   : > { %v868_v40 = vpop.permute.xlu1 %867  ;;  %v1445_v0 = vsel %vm1417_vm3, %v4465_v63, %v4464_v4 }
 0x13b   : > { %v3486_v32 = vsel %vm1483_vm5, %v1476_v52, %v868_v40  ;;  %v866_v16 = vpop.permute.xlu0 %865  ;;  %v1478_v1 = vsel %vm1450_vm4, %v1445_v0, %v3259_v60  ;;  %v4472_v60 = vld [vmem:[#allocation69_spill] sm:$0xff]  ;;  %v4480_v52 = vld [vmem:[#allocation84_spill] sm:$0xff] }
 0x13c   : > { %v3489_v27 = vsel %vm1483_vm5, %v1475_v47, %v866_v16  ;;  %1128 = vrot.lane.b32.xlu1 %v2532_v30, %s2407_s6  ;;  %v1446_v39 = vsel %vm1417_vm3, %v4473_v37, %v4472_v60  ;;  %v4485_v60 = vld [vmem:[#allocation47_spill] sm:$0xff] }
 0x13d   : > { %1158 = vrot.lane.b32.xlu0 %v4462_v11, %s2407_s6  ;;  %v1479_v51 = vsel %vm1450_vm4, %v1446_v39, %v4474_v36  ;;  %v4479_v11 = vld [vmem:[#allocation30_spill] sm:$0xff]  ;;  %v4486_v37 = vld [vmem:[#allocation35_spill] sm:$0xff] }
 0x13e   : > { %v872_v12 = vpop.permute.xlu1 %871  ;;  %v1448_v15 = vsel %vm1417_vm3, %v4479_v11, %v4478_v28  ;;  %v4487_v28 = vld [vmem:[#allocation28_spill] sm:$0xff] }
 0x13f   : > { %v3506_v30 = vsel %vm1483_vm5, %v1478_v1, %v872_v12  ;;  %v870_v10 = vpop.permute.xlu0 %869  ;;  %v1481_v47 = vsel %vm1450_vm4, %v1448_v15, %v3277_v61  ;;  %v4484_v61 = vld [vmem:[#allocation36_spill] sm:$0xff] }
 0x140   : > { %v3509_v23 = vsel %vm1483_vm5, %v1477_v24, %v870_v10  ;;  %1228 = vrot.lane.b32.xlu1 %v4469_v44, %s2408_s11 }
 0x141   : > { %1160 = vrot.lane.b32.xlu0 %v4460_v19, %s2407_s6  ;;  %v4476_v19 = vld [vmem:[#allocation70_spill] sm:$0xff] }
 0x142   : > { %v876_v58 = vpop.permute.xlu1 %875  ;;  %v1449_v43 = vsel %vm1417_vm3, %v4477_v59, %v4476_v19  ;;  %v2361_v19 = vld [vmem:[%s2461_s22 + $0x80] sm:$0xff] }
 0x143   : > { %v3526_v57 = vsel %vm1483_vm5, %v1480_v26, %v876_v58  ;;  %v874_v45 = vpop.permute.xlu0 %873  ;;  %v1482_v40 = vsel %vm1450_vm4, %v1449_v43, %v4480_v52 }
 0x144   : > { %v3529_v8 = vsel %vm1483_vm5, %v1479_v51, %v874_v45  ;;  %963 = vrot.lane.b32.xlu1 %v4475_v49, %s2405_s30  ;;  %v2360_v51 = vld [vmem:[%s2461_s22 + $0x78] sm:$0xff] }
 0x145   : > { %1260 = vrot.lane.b32.xlu0 %v4475_v49, %s2408_s11 }
 0x146   : > { %v880_v29 = vpop.permute.xlu1 %879 }
 0x147   : > { %v3546_v16 = vsel %vm1483_vm5, %v1482_v40, %v880_v29  ;;  %v878_v4 = vpop.permute.xlu0 %877  ;;  %v3614_v40 = vld [vmem:[%s2461_s22 + $0xc0] sm:$0xff]  ;;  %v4489_v29 = vld [vmem:[#allocation60_spill] sm:$0xff] }
 0x148   : > { %v3549_v0 = vsel %vm1483_vm5, %v1481_v47, %v878_v4  ;;  %1262 = vrot.lane.b32.xlu1 %v4481_v2, %s2408_s11  ;;  %v1434_v47 = vsel %vm1417_vm3, %v3614_v40, %v4489_v29  ;;  %v4490_v4 = vld [vmem:[#allocation27_spill] sm:$0xff] }
 0x149   : > { %1230 = vrot.lane.b32.xlu0 %v4482_v41, %s2408_s11 }
 0x14a   : > { %v3555_v1 = vpop.permute.xlu1 %921 }
 0x14b   : > { %v920_v12 = vpop.permute.xlu0 %919 }
 0x14c   : > { %1361 = vrot.lane.b32.xlu1 %v4483_v62, %s2409_s23 }
 0x14d   : > { %1329 = vrot.lane.b32.xlu0 %v4484_v61, %s2409_s23 }
 0x14e   : > { %v3561_v24 = vpop.permute.xlu1 %925 }
 0x14f   : > { %v3563_v10 = vpop.permute.xlu0 %923 }
 0x150   : > { %965 = vrot.lane.b32.xlu1 %v4481_v2, %s2405_s30  ;;  %v2363_v2 = vld [vmem:[%s2461_s22] sm:$0xff] }
 0x151   : > { %933 = vrot.lane.b32.xlu0 %v4482_v41, %s2405_s30  ;;  %v4491_v41 = vld [vmem:[#allocation52_spill] sm:$0xff] }
 0x152   : > { %v3569_v44 = vpop.permute.xlu1 %929 }
 0x153   : > { %v3571_v42 = vpop.permute.xlu0 %927 }
 0x154   : > { %1064 = vrot.lane.b32.xlu1 %v4483_v62, %s2406_s5  ;;  %v1418_v62 = vsel %vm1417_vm3, %v2363_v2, %v4491_v41 }
 0x155   : > { %1032 = vrot.lane.b32.xlu0 %v4484_v61, %s2406_s5  ;;  %v4492_v61 = vld [vmem:[#allocation78_spill] sm:$0xff] }
 0x156   : > { %v952_v50 = vpop.permute.xlu1 %951 }
 0x157   : > { %v3577_v3 = vpop.permute.xlu0 %931 }
 0x158   : > { %1363 = vrot.lane.b32.xlu1 %v4485_v60, %s2409_s23 }
 0x159   : > { %1331 = vrot.lane.b32.xlu0 %v4486_v37, %s2409_s23 }
 0x15a   : > { %v1021_v39 = vpop.permute.xlu1 %1020 }
 0x15b   : > { %v3583_v26 = vpop.permute.xlu0 %953 }
 0x15c   : > { %1066 = vrot.lane.b32.xlu1 %v4485_v60, %s2406_s5  ;;  %v1467_v60 = vsel %vm1450_vm4, %v1434_v47, %v4492_v61 }
 0x15d   : > { %1034 = vrot.lane.b32.xlu0 %v4486_v37, %s2406_s5  ;;  %v4493_v37 = vld [vmem:[#allocation5_spill] sm:$0xff] }
 0x15e   : > { %v3589_v58 = vpop.permute.xlu1 %1022 }
 0x15f   : > { %v1053_v36 = vpop.permute.xlu0 %1052 }
 0x160   : > { %1162 = vrot.lane.b32.xlu1 %v4467_v48, %s2407_s6  ;;  %v4488_v48 = vld [vmem:[#allocation6_spill] sm:$0xff] }
 0x161   : > { %1130 = vrot.lane.b32.xlu0 %v2360_v51, %s2407_s6  ;;  %v4494_v51 = vld [vmem:[#allocation73_spill] sm:$0xff] }
 0x162   : > { %v1119_v45 = vpop.permute.xlu1 %1118 }
 0x163   : > { %v3595_v49 = vpop.permute.xlu0 %1054 }
 0x164   : > { %1164 = vrot.lane.b32.xlu1 %v4465_v63, %s2407_s6 }
 0x165   : > { %1132 = vrot.lane.b32.xlu0 %v2361_v19, %s2407_s6  ;;  %v1451_v19 = vsel %vm1450_vm4, %v1418_v62, %v4494_v51  ;;  %v4495_v62 = vld [vmem:[#allocation51_spill] sm:$0xff] }
 0x166   : > { %v1121_v59 = vpop.permute.xlu1 %1120  ;;  %v1484_v29 = vsel %vm1483_vm5, %v1451_v19, %v3285_v7  ;;  %v4496_v7 = vld [vmem:[#allocation38_spill] sm:$0xff] }
 0x167   : > { %v1151_v43 = vpop.permute.xlu0 %1150  ;;  %v1517_v47 = vsel %vm1516_vm6, %v1484_v29, %v920_v12  ;;  %v2364_v29 = vld [vmem:[%s2461_s22 + $0x8] sm:$0xff] }
 0x168   : > { %1264 = vrot.lane.b32.xlu1 %v4487_v28, %s2408_s11 }
 0x169   : > { %1232 = vrot.lane.b32.xlu0 %v4488_v48, %s2408_s11 }
 0x16a   : > { %v1221_v11 = vpop.permute.xlu1 %1220 }
 0x16b   : > { %v3605_v15 = vpop.permute.xlu0 %1152 }
 0x16c   : > { %967 = vrot.lane.b32.xlu1 %v4487_v28, %s2405_s30  ;;  %v1500_v28 = vsel %vm1483_vm5, %v1467_v60, %v3421_v56  ;;  %v1550_v56 = vsel %vm1549_vm7, %v1517_v47, %v1021_v39 }
 0x16d   : > { %935 = vrot.lane.b32.xlu0 %v4488_v48, %s2405_s30  ;;  %v1533_v2 = vsel %vm1516_vm6, %v1500_v28, %v952_v50  ;;  %v1583_v50 = vsel %vm1582_vm8, %v1550_v56, %v1119_v45  ;;  %v4498_v45 = vld [vmem:[#allocation72_spill] sm:$0xff] }
 0x16e   : > { %v3611_v63 = vpop.permute.xlu1 %955  ;;  %v1566_v61 = vsel %vm1549_vm7, %v1533_v2, %v1053_v36  ;;  %v1616_v36 = vsel %vm1615_vm9, %v1583_v50, %v1221_v11  ;;  %v4497_v2 = vld [vmem:[#allocation56_spill] sm:$0xff] }
 0x16f   : > { %v1253_v52 = vpop.permute.xlu0 %1252  ;;  %v1599_v60 = vsel %vm1582_vm8, %v1566_v61, %v1151_v43  ;;  %v1419_v39 = vsel %vm1417_vm3, %v2364_v29, %v4497_v2 }
 0x170   : > { %1266 = vrot.lane.b32.xlu1 %v4490_v4, %s2408_s11  ;;  %v1632_v51 = vsel %vm1615_vm9, %v1599_v60, %v1253_v52  ;;  %v1452_v52 = vsel %vm1450_vm4, %v1419_v39, %v4498_v45  ;;  %v3672_v60 = vld [vmem:[%s2461_s22 + $0xc8] sm:$0xff] }
 0x171   : > { %1234 = vrot.lane.b32.xlu0 %v4493_v37, %s2408_s11  ;;  %v1485_v11 = vsel %vm1483_vm5, %v1452_v52, %v3283_v25 }
 0x172   : > { %v1255_v48 = vpop.permute.xlu1 %1254 }
 0x173   : > { %v1223_v41 = vpop.permute.xlu0 %1222 }
 0x174   : > { %1365 = vrot.lane.b32.xlu1 %v4495_v62, %s2409_s23 }
 0x175   : > { %1333 = vrot.lane.b32.xlu0 %v4496_v7, %s2409_s23 }
 0x176   : > { %v1354_v12 = vpop.permute.xlu1 %1353 }
 0x177   : > { %v1322_v19 = vpop.permute.xlu0 %1321  ;;  %v1665_v28 = vsel %vm1648_vm10, %v1632_v51, %v1354_v12 }
 0x178   : > { %969 = vrot.lane.b32.xlu1 %v4490_v4, %s2405_s30  ;;  %v1649_v43 = vsel %vm1648_vm10, %v1616_v36, %v1322_v19  ;;  %2287 = vmatprep.mubr.msk.f32.mxu1 %vm1693_vm11, %v1665_v28  ;;  %v1518_v4 = vsel %vm1516_vm6, %v1485_v11, %v3555_v1  ;;  %v4500_v1 = vld [vmem:[#allocation2_spill] sm:$0xff]  ;;  %v2368_v11 = vld [vmem:[%s2461_s22 + $0x158] sm:$0xff] }
 0x179   : > { %937 = vrot.lane.b32.xlu0 %v4493_v37, %s2405_s30  ;;  %2263 = vmatprep.mubr.msk.f32.mxu0 %vm1693_vm11, %v1649_v43  ;;  %v1551_v56 = vsel %vm1549_vm7, %v1518_v4, %v3589_v58  ;;  %v4499_v37 = vld [vmem:[#allocation59_spill] sm:$0xff]  ;;  %v2369_v4 = vld [vmem:[%s2461_s22 + $0x98] sm:$0xff] }
 0x17a   : > { %v3661_v47 = vpop.permute.xlu1 %1024  ;;  %v1435_v50 = vsel %vm1417_vm3, %v3672_v60, %v4499_v37  ;;  %v1584_v25 = vsel %vm1582_vm8, %v1551_v56, %v1121_v59  ;;  %v4501_v59 = vld [vmem:[#allocation49_spill] sm:$0xff] }
 0x17b   : > { %v3665_v61 = vpop.permute.xlu0 %957  ;;  %v1468_v51 = vsel %vm1450_vm4, %v1435_v50, %v4500_v1  ;;  %v1617_v12 = vsel %vm1615_vm9, %v1584_v25, %v1223_v41  ;;  %v4503_v50 = vld [vmem:[#allocation32_spill] sm:$0xff] }
 0x17c   : > { %1068 = vrot.lane.b32.xlu1 %v4495_v62, %s2406_s5  ;;  %v1501_v62 = vsel %vm1483_vm5, %v1468_v51, %v3419_v33  ;;  %v4504_v25 = vld [vmem:[#allocation8_spill] sm:$0xff] }
 0x17d   : > { %1036 = vrot.lane.b32.xlu0 %v4496_v7, %s2406_s5  ;;  %v1534_v28 = vsel %vm1516_vm6, %v1501_v62, %v3583_v26  ;;  %v4502_v7 = vld [vmem:[#allocation37_spill] sm:$0xff] }
 0x17e   : > { %v1324_v58 = vpop.permute.xlu1 %1323  ;;  %v1567_v41 = vsel %vm1549_vm7, %v1534_v28, %v3595_v49  ;;  %v4506_v28 = vld [vmem:[#allocation50_spill] sm:$0xff] }
 0x17f   : > { %v1650_v36 = vsel %vm1648_vm10, %v1617_v12, %v1324_v58  ;;  %v1057_v19 = vpop.permute.xlu0 %1056  ;;  %v1600_v33 = vsel %vm1582_vm8, %v1567_v41, %v3605_v15  ;;  %v2366_v15 = vld [vmem:[%s2461_s22 + $0x150] sm:$0xff]  ;;  %v3723_v12 = vld [vmem:[%s2461_s22 + $0xd8] sm:$0xff]  ;;  %v4505_v58 = vld [vmem:[#allocation62_spill] sm:$0xff] }
 0x180   : > { %1367 = vrot.lane.b32.xlu1 %v4501_v59, %s2409_s23  ;;  %2264 = vmatmul.mubr.msk.f32.vlgmr.msra.gmra.mrb[0].mxu0 %vm1693_vm11, %v1650_v36  ;;  %v1633_v26 = vsel %vm1615_vm9, %v1600_v33, %v1255_v48  ;;  %v2367_v48 = vld [vmem:[%s2461_s22 + $0x90] sm:$0xff]  ;;  %v1436_v62 = vsel %vm1417_vm3, %v3723_v12, %v4505_v58  ;;  %v2371_v36 = vld [vmem:[%s2461_s22 + $0x18] sm:$0xff]  ;;  %v4508_v33 = vld [vmem:[#allocation75_spill] sm:$0xff] }
 0x181   : > { %1335 = vrot.lane.b32.xlu0 %v4502_v7, %s2409_s23  ;;  %v4507_v41 = vld [vmem:[#allocation80_spill] sm:$0xff]  ;;  %v4510_v58 = vld [vmem:[#allocation31_spill] sm:$0xff] }
 0x182   : > { %v3697_v29 = vpop.permute.xlu1 %1026 }
 0x183   : > { %v1356_v2 = vpop.permute.xlu0 %1355 }
 0x184   : > { %v1666_v39 = vsel %vm1648_vm10, %v1633_v26, %v1356_v2  ;;  %1070 = vrot.lane.b32.xlu1 %v4501_v59, %s2406_s5  ;;  %v1420_v59 = vsel %vm1417_vm3, %v2371_v36, %v4506_v28  ;;  %v4511_v36 = vld [vmem:[#allocation7_spill] sm:$0xff] }
 0x185   : > { %1038 = vrot.lane.b32.xlu0 %v4502_v7, %s2406_s5  ;;  %2288 = vmatmul.mubr.msk.f32.vlgmr.msra.gmra.mrb[0].mxu1 %vm1693_vm11, %v1666_v39  ;;  %v1469_v7 = vsel %vm1450_vm4, %v1436_v62, %v4507_v41  ;;  %v1453_v26 = vsel %vm1450_vm4, %v1420_v59, %v4508_v33  ;;  %v4512_v33 = vld [vmem:[#allocation54_spill] sm:$0xff] }
 0x186   : > { %v1123_v49 = vpop.permute.xlu1 %1122  ;;  %v1502_v2 = vsel %vm1483_vm5, %v1469_v7, %v3429_v31  ;;  %v2372_v7 = vld [vmem:[%s2461_s22 + $0x20] sm:$0xff] }
 0x187   : > { %v3706_v43 = vpop.permute.xlu0 %1058 }
 0x188   : > { %1166 = vrot.lane.b32.xlu1 %v2366_v15, %s2407_s6  ;;  %v4509_v15 = vld [vmem:[#allocation86_spill] sm:$0xff] }
 0x189   : > { %1134 = vrot.lane.b32.xlu0 %v2367_v48, %s2407_s6  ;;  %v1486_v48 = vsel %vm1483_vm5, %v1453_v26, %v4509_v15  ;;  %v4513_v26 = vld [vmem:[#allocation55_spill] sm:$0xff] }
 0x18a   : > { %v1125_v45 = vpop.permute.xlu1 %1124 }
 0x18b   : > { %v1155_v52 = vpop.permute.xlu0 %1154 }
 0x18c   : > { %1168 = vrot.lane.b32.xlu1 %v2368_v11, %s2407_s6  ;;  %v1535_v11 = vsel %vm1516_vm6, %v1502_v2, %v3611_v63  ;;  %v4516_v2 = vld [vmem:[#allocation85_spill] sm:$0xff] }
 0x18d   : > { %1136 = vrot.lane.b32.xlu0 %v2369_v4, %s2407_s6 }
 0x18e   : > { %v1225_v56 = vpop.permute.xlu1 %1224 }
 0x18f   : > { %v1157_v37 = vpop.permute.xlu0 %1156 }
 0x190   : > { %1268 = vrot.lane.b32.xlu1 %v4503_v50, %s2408_s11 }
 0x191   : > { %1236 = vrot.lane.b32.xlu0 %v4504_v25, %s2408_s11 }
 0x192   : > { %v3720_v1 = vpop.permute.xlu1 %959 }
 0x193   : > { %v1257_v51 = vpop.permute.xlu0 %1256 }
 0x194   : > { %971 = vrot.lane.b32.xlu1 %v4503_v50, %s2405_s30  ;;  %v1519_v50 = vsel %vm1516_vm6, %v1486_v48, %v3563_v10 }
 0x195   : > { %939 = vrot.lane.b32.xlu0 %v4504_v25, %s2405_s30  ;;  %v1568_v25 = vsel %vm1549_vm7, %v1535_v11, %v1057_v19  ;;  %v1552_v31 = vsel %vm1549_vm7, %v1519_v50, %v3661_v47  ;;  %v1421_v47 = vsel %vm1417_vm3, %v2372_v7, %v4512_v33 }
 0x196   : > { %v1259_v39 = vpop.permute.xlu1 %1258  ;;  %v1601_v62 = vsel %vm1582_vm8, %v1568_v25, %v1155_v52  ;;  %v1585_v28 = vsel %vm1582_vm8, %v1552_v31, %v1123_v49  ;;  %v4514_v49 = vld [vmem:[#allocation74_spill] sm:$0xff] }
 0x197   : > { %v1227_v4 = vpop.permute.xlu0 %1226  ;;  %v1634_v63 = vsel %vm1615_vm9, %v1601_v62, %v1257_v51  ;;  %v1618_v10 = vsel %vm1615_vm9, %v1585_v28, %v1225_v56  ;;  %v1454_v51 = vsel %vm1450_vm4, %v1421_v47, %v4514_v49  ;;  %v4515_v56 = vld [vmem:[#allocation40_spill] sm:$0xff]  ;;  %v3782_v31 = vld [vmem:[%s2461_s22 + $0xe0] sm:$0xff]  ;;  %v4517_v62 = vld [vmem:[#allocation61_spill] sm:$0xff] }
 0x198   : > { %1270 = vrot.lane.b32.xlu1 %v4510_v58, %s2408_s11  ;;  %v1487_v15 = vsel %vm1483_vm5, %v1454_v51, %v4516_v2  ;;  %v1437_v28 = vsel %vm1417_vm3, %v3782_v31, %v4517_v62  ;;  %v4519_v47 = vld [vmem:[#allocation53_spill] sm:$0xff]  ;;  %v2374_v49 = vld [vmem:[%s2461_s22 + $0x168] sm:$0xff] }
 0x199   : > { %1238 = vrot.lane.b32.xlu0 %v4511_v36, %s2408_s11  ;;  %v1520_v11 = vsel %vm1516_vm6, %v1487_v15, %v3561_v24  ;;  %v4518_v24 = vld [vmem:[#allocation79_spill] sm:$0xff]  ;;  %v2376_v15 = vld [vmem:[%s2461_s22 + $0x170] sm:$0xff] }
 0x19a   : > { %v1358_v59 = vpop.permute.xlu1 %1357  ;;  %v1553_v25 = vsel %vm1549_vm7, %v1520_v11, %v3697_v29  ;;  %v2375_v51 = vld [vmem:[%s2461_s22 + $0xa8] sm:$0xff]  ;;  %v2377_v11 = vld [vmem:[%s2461_s22 + $0xb0] sm:$0xff]  ;;  %s2215_s22 = sshll.u32 %s4544_s15, 8 }
 0x19b   : > { %v1667_v19 = vsel %vm1648_vm10, %v1634_v63, %v1358_v59  ;;  %v1326_v41 = vpop.permute.xlu0 %1325  ;;  %v1586_v63 = vsel %vm1582_vm8, %v1553_v25, %v1125_v45  ;;  %v1470_v59 = vsel %vm1450_vm4, %v1437_v28, %v4518_v24  ;;  %v4521_v28 = vld [vmem:[#allocation34_spill] sm:$0xff]  ;;  %s4079_s28 = scalar_lea.vmem %s4255_s4, %s2215_s22 }
 0x19c   : > { %v1651_v52 = vsel %vm1648_vm10, %v1618_v10, %v1326_v41  ;;  %1369 = vrot.lane.b32.xlu1 %v4513_v26, %s2409_s23  ;;  %2290 = vmatprep.mubr.msk.f32.mxu1 %vm1693_vm11, %v1667_v19  ;;  %v1619_v10 = vsel %vm1615_vm9, %v1586_v63, %v1227_v4  ;;  %v4522_v63 = vld [vmem:[#allocation10_spill] sm:$0xff] }
 0x19d   : > { %1337 = vrot.lane.b32.xlu0 %v4515_v56, %s2409_s23  ;;  %2266 = vmatprep.mubr.msk.f32.mxu0 %vm1693_vm11, %v1651_v52  ;;  %v4520_v52 = vld [vmem:[#allocation39_spill] sm:$0xff] }
 0x19e   : > { %v1029_v48 = vpop.permute.xlu1 %1028 }
 0x19f   : > { %v3775_v50 = vpop.permute.xlu0 %961 }
 0x1a0   : > { %973 = vrot.lane.b32.xlu1 %v4510_v58, %s2405_s30  ;;  %v1503_v58 = vsel %vm1483_vm5, %v1470_v59, %v3427_v20  ;;  %v1537_v59 = vsel %vm1516_vm6, %v3449_v34, %v3720_v1 }
 0x1a1   : > { %941 = vrot.lane.b32.xlu0 %v4511_v36, %s2405_s30  ;;  %v1536_v7 = vsel %vm1516_vm6, %v1503_v58, %v3665_v61 }
 0x1a2   : > { %v1328_v29 = vpop.permute.xlu1 %1327  ;;  %v1569_v45 = vsel %vm1549_vm7, %v1536_v7, %v3706_v43 }
 0x1a3   : > { %v1652_v19 = vsel %vm1648_vm10, %v1619_v10, %v1328_v29  ;;  %v1061_v41 = vpop.permute.xlu0 %1060  ;;  %v1602_v20 = vsel %vm1582_vm8, %v1569_v45, %v1157_v37  ;;  %v1521_v29 = vsel %vm1516_vm6, %v3313_v21, %v3571_v42 }
 0x1a4   : > { %1072 = vrot.lane.b32.xlu1 %v4513_v26, %s2406_s5  ;;  %2267 = vmatmul.mubr.msk.f32.gmra.mrb[2].mxu0 %vm1693_vm11, %v1652_v19  ;;  %v1635_v36 = vsel %vm1615_vm9, %v1602_v20, %v1259_v39  ;;  %v1570_v58 = vsel %vm1549_vm7, %v1537_v59, %v1061_v41  ;;  %v1554_v19 = vsel %vm1549_vm7, %v1521_v29, %v1029_v48  ;;  %v4524_v48 = vld [vmem:[#allocation9_spill] sm:$0xff] }
 0x1a5   : > { %1040 = vrot.lane.b32.xlu0 %v4515_v56, %s2406_s5 }
 0x1a6   : > { %v1031_v4 = vpop.permute.xlu1 %1030 }
 0x1a7   : > { %v1360_v33 = vpop.permute.xlu0 %1359 }
 0x1a8   : > { %v1668_v61 = vsel %vm1648_vm10, %v1635_v36, %v1360_v33  ;;  %1371 = vrot.lane.b32.xlu1 %v4519_v47, %s2409_s23  ;;  %v4523_v36 = vld [vmem:[#allocation33_spill] sm:$0xff] }
 0x1a9   : > { %1339 = vrot.lane.b32.xlu0 %v4520_v52, %s2409_s23  ;;  %2291 = vmatmul.mubr.msk.f32.gmra.mrb[2].mxu1 %vm1693_vm11, %v1668_v61 }
 0x1aa   : > { %v1127_v43 = vpop.permute.xlu1 %1126 }
 0x1ab   : > { %v1063_v26 = vpop.permute.xlu0 %1062  ;;  %v1587_v45 = vsel %vm1582_vm8, %v1554_v19, %v1127_v43  ;;  %v4530_v19 = vld [vmem:[#allocation76_spill] sm:$0xff] }
 0x1ac   : > { %1074 = vrot.lane.b32.xlu1 %v4519_v47, %s2406_s5  ;;  %v4525_v47 = vld [vmem:[#allocation58_spill] sm:$0xff] }
 0x1ad   : > { %1042 = vrot.lane.b32.xlu0 %v4520_v52, %s2406_s5  ;;  %v4526_v52 = vld [vmem:[#allocation42_spill] sm:$0xff] }
 0x1ae   : > { %v1129_v37 = vpop.permute.xlu1 %1128 }
 0x1af   : > { %v1159_v39 = vpop.permute.xlu0 %1158 }
 0x1b0   : > { %1170 = vrot.lane.b32.xlu1 %v2374_v49, %s2407_s6  ;;  %v1603_v7 = vsel %vm1582_vm8, %v1570_v58, %v1159_v39  ;;  %v1538_v39 = vsel %vm1516_vm6, %v3446_v55, %v3775_v50  ;;  %v4529_v58 = vld [vmem:[#allocation77_spill] sm:$0xff] }
 0x1b1   : > { %1138 = vrot.lane.b32.xlu0 %v2375_v51, %s2407_s6  ;;  %v1522_v51 = vsel %vm1516_vm6, %v3310_v18, %v3569_v44 }
 0x1b2   : > { %v1229_v56 = vpop.permute.xlu1 %1228 }
 0x1b3   : > { %v1161_v2 = vpop.permute.xlu0 %1160  ;;  %v1620_v20 = vsel %vm1615_vm9, %v1587_v45, %v1229_v56  ;;  %v1571_v56 = vsel %vm1549_vm7, %v1538_v39, %v1063_v26  ;;  %v914_v45 = vrot.slane %v4529_v58, 1  ;;  %v1523_v39 = vsel %vm1516_vm6, %v3333_v13, %v3577_v3 }
 0x1b4   : > { %1172 = vrot.lane.b32.xlu1 %v2376_v15, %s2407_s6  ;;  %v1555_v15 = vsel %vm1549_vm7, %v1522_v51, %v1031_v4 }
 0x1b5   : > { %1140 = vrot.lane.b32.xlu0 %v2377_v11, %s2407_s6  ;;  %v1604_v11 = vsel %vm1582_vm8, %v1571_v56, %v1161_v2  ;;  %v4527_v2 = vld [vmem:[#allocation57_spill] sm:$0xff]  ;;  %v1015_v56 = vrot.slane %v4529_v58, 2 }
 0x1b6   : > { %v3825_v25 = vpop.permute.xlu1 %963 }
 0x1b7   : > { %v1261_v62 = vpop.permute.xlu0 %1260 }
 0x1b8   : > { %1272 = vrot.lane.b32.xlu1 %v4521_v28, %s2408_s11  ;;  %v1636_v34 = vsel %vm1615_vm9, %v1603_v7, %v1261_v62  ;;  %v1588_v62 = vsel %vm1582_vm8, %v1555_v15, %v1129_v37  ;;  %v915_v7 = vrot.slane %v4530_v19, 1 }
 0x1b9   : > { %1240 = vrot.lane.b32.xlu0 %v4522_v63, %s2408_s11 }
 0x1ba   : > { %v1263_v24 = vpop.permute.xlu1 %1262 }
 0x1bb   : > { %v1231_v10 = vpop.permute.xlu0 %1230  ;;  %v1637_v55 = vsel %vm1615_vm9, %v1604_v11, %v1263_v24 }
 0x1bc   : > { %975 = vrot.lane.b32.xlu1 %v4521_v28, %s2405_s30  ;;  %v1621_v28 = vsel %vm1615_vm9, %v1588_v62, %v1231_v10 }
 0x1bd   : > { %943 = vrot.lane.b32.xlu0 %v4522_v63, %s2405_s30  ;;  %v4528_v63 = vld [vmem:[#allocation41_spill] sm:$0xff] }
 0x1be   : > { %v1362_v1 = vpop.permute.xlu1 %1361 }
 0x1bf   : > { %v1669_v21 = vsel %vm1648_vm10, %v1636_v34, %v1362_v1  ;;  %v1330_v42 = vpop.permute.xlu0 %1329 }
 0x1c0   : > { %v1653_v41 = vsel %vm1648_vm10, %v1620_v20, %v1330_v42  ;;  %1274 = vrot.lane.b32.xlu1 %v4523_v36, %s2408_s11  ;;  %2293 = vmatprep.mubr.msk.f32.mxu1 %vm1693_vm11, %v1669_v21  ;;  %v916_v20 = vsel %vm461_vm0, %v914_v45, %v915_v7  ;;  %v409_v42 = vld [vmem:[%s3142_s29 + $0x10] sm:$0x3] }
 0x1c1   : > { %1242 = vrot.lane.b32.xlu0 %v4524_v48, %s2408_s11  ;;  %2269 = vmatprep.mubr.msk.f32.mxu0 %vm1693_vm11, %v1653_v41  ;;  %v1018_v45 = vrot.slane %v409_v42, 2 }
 0x1c2   : > { %v3855_v33 = vpop.permute.xlu1 %965 }
 0x1c3   : > { %v3857_v61 = vpop.permute.xlu0 %933 }
 0x1c4   : > { %1373 = vrot.lane.b32.xlu1 %v4525_v47, %s2409_s23 }
 0x1c5   : > { %1341 = vrot.lane.b32.xlu0 %v4526_v52, %s2409_s23 }
 0x1c6   : > { %v1065_v43 = vpop.permute.xlu1 %1064 }
 0x1c7   : > { %v1033_v49 = vpop.permute.xlu0 %1032 }
 0x1c8   : > { %977 = vrot.lane.b32.xlu1 %v4523_v36, %s2405_s30  ;;  %v4531_v36 = vld [vmem:[#allocation12_spill] sm:$0xff]  ;;  %v1556_v15 = vsel %vm1549_vm7, %v1523_v39, %v1033_v49  ;;  %v4532_v49 = vld [vmem:[#allocation11_spill] sm:$0xff] }
 0x1c9   : > { %945 = vrot.lane.b32.xlu0 %v4524_v48, %s2405_s30 }
 0x1ca   : > { %v1364_v50 = vpop.permute.xlu1 %1363 }
 0x1cb   : > { %v1670_v18 = vsel %vm1648_vm10, %v1637_v55, %v1364_v50  ;;  %v1332_v44 = vpop.permute.xlu0 %1331 }
 0x1cc   : > { %v1654_v26 = vsel %vm1648_vm10, %v1621_v28, %v1332_v44  ;;  %1076 = vrot.lane.b32.xlu1 %v4525_v47, %s2406_s5  ;;  %2294 = vmatmul.mubr.msk.f32.gmra.mrb[4].mxu1 %vm1693_vm11, %v1670_v18  ;;  %v1539_v47 = vsel %vm1516_vm6, %v3469_v53, %v3825_v25 }
 0x1cd   : > { %1044 = vrot.lane.b32.xlu0 %v4526_v52, %s2406_s5  ;;  %2270 = vmatmul.mubr.msk.f32.gmra.mrb[4].mxu0 %vm1693_vm11, %v1654_v26  ;;  %v1572_v51 = vsel %vm1549_vm7, %v1539_v47, %v1065_v43  ;;  %v4533_v26 = vld [vmem:[#allocation44_spill] sm:$0xff]  ;;  %v411_v47 = vld [vmem:[%s3142_s29 + $0x20] sm:$0xff] }
 0x1ce   : > { %v1067_v4 = vpop.permute.xlu1 %1066  ;;  %v1216_v39 = vrot.slane %v411_v47, 1 }
 0x1cf   : > { %v1035_v37 = vpop.permute.xlu0 %1034 }
 0x1d0   : > { %1375 = vrot.lane.b32.xlu1 %v4527_v2, %s2409_s23 }
 0x1d1   : > { %1343 = vrot.lane.b32.xlu0 %v4528_v63, %s2409_s23 }
 0x1d2   : > { %v1163_v24 = vpop.permute.xlu1 %1162 }
 0x1d3   : > { %v1131_v59 = vpop.permute.xlu0 %1130  ;;  %v1605_v11 = vsel %vm1582_vm8, %v1572_v51, %v1163_v24 }
 0x1d4   : > { %1078 = vrot.lane.b32.xlu1 %v4527_v2, %s2406_s5  ;;  %v1589_v25 = vsel %vm1582_vm8, %v1556_v15, %v1131_v59  ;;  %v1524_v59 = vsel %vm1516_vm6, %v3330_v14, %v3857_v61 }
 0x1d5   : > { %1046 = vrot.lane.b32.xlu0 %v4528_v63, %s2406_s5  ;;  %v1540_v63 = vsel %vm1516_vm6, %v3466_v5, %v3855_v33 }
 0x1d6   : > { %v1165_v10 = vpop.permute.xlu1 %1164 }
 0x1d7   : > { %v1133_v29 = vpop.permute.xlu0 %1132 }
 0x1d8   : > { %1174 = vrot.lane.b32.xlu1 %v4529_v58, %s2407_s6  ;;  %v1573_v58 = vsel %vm1549_vm7, %v1540_v63, %v1067_v4 }
 0x1d9   : > { %1142 = vrot.lane.b32.xlu0 %v3614_v40, %s2407_s6  ;;  %v917_v40 = vrot.slane %v409_v42, 1 }
 0x1da   : > { %v1265_v34 = vpop.permute.xlu1 %1264 }
 0x1db   : > { %v1233_v1 = vpop.permute.xlu0 %1232  ;;  %v918_v53 = vsel %vm461_vm0, %v915_v7, %v917_v40  ;;  %v1638_v62 = vsel %vm1615_vm9, %v1605_v11, %v1265_v34  ;;  %v1606_v7 = vsel %vm1582_vm8, %v1573_v58, %v1165_v10  ;;  %v410_v40 = vld [vmem:[%s3142_s29 + $0x18] sm:$0xff] }
 0x1dc   : > { %1176 = vrot.lane.b32.xlu1 %v4530_v19, %s2407_s6  ;;  %v1622_v3 = vsel %vm1615_vm9, %v1589_v25, %v1233_v1 }
 0x1dd   : > { %1144 = vrot.lane.b32.xlu0 %v3672_v60, %s2407_s6  ;;  %v1016_v60 = vrot.slane %v4530_v19, 2  ;;  %v1557_v19 = vsel %vm1549_vm7, %v1524_v59, %v1035_v37  ;;  %v4536_v59 = vld [vmem:[#allocation13_spill] sm:$0xff] }
 0x1de   : > { %v3906_v21 = vpop.permute.xlu1 %967  ;;  %v1590_v34 = vsel %vm1582_vm8, %v1557_v19, %v1133_v29 }
 0x1df   : > { %v3909_v41 = vpop.permute.xlu0 %935  ;;  %v1017_v28 = vsel %vm638_vm1, %v1015_v56, %v1016_v60  ;;  %v1019_v37 = vsel %vm638_vm1, %v1016_v60, %v1018_v45  ;;  %v1215_v60 = vrot.slane %v410_v40, 1  ;;  %v412_v56 = vld [vmem:[%s3142_s29 + $0x28] sm:$0x3]  ;;  %v4537_v45 = vld [vmem:[#allocation46_spill] sm:$0xff] }
 0x1e0   : > { %1276 = vrot.lane.b32.xlu1 %v916_v20, %s2408_s11  ;;  %v1319_v19 = vrot.slane %v412_v56, 2 }
 0x1e1   : > { %1244 = vrot.lane.b32.xlu0 %v4531_v36, %s2408_s11  ;;  %v1217_v11 = vsel %vm461_vm0, %v1215_v60, %v1216_v39 }
 0x1e2   : > { %v1267_v48 = vpop.permute.xlu1 %1266 }
 0x1e3   : > { %v1235_v52 = vpop.permute.xlu0 %1234  ;;  %v1639_v5 = vsel %vm1615_vm9, %v1606_v7, %v1267_v48 }
 0x1e4   : > { %979 = vrot.lane.b32.xlu1 %v916_v20, %s2405_s30  ;;  %v1623_v1 = vsel %vm1615_vm9, %v1590_v34, %v1235_v52  ;;  %v4534_v20 = vld [vmem:[#allocation43_spill] sm:$0xff] }
 0x1e5   : > { %947 = vrot.lane.b32.xlu0 %v4531_v36, %s2405_s30 }
 0x1e6   : > { %v1366_v13 = vpop.permute.xlu1 %1365 }
 0x1e7   : > { %v1671_v43 = vsel %vm1648_vm10, %v1638_v62, %v1366_v13  ;;  %v1334_v55 = vpop.permute.xlu0 %1333  ;;  %v1316_v13 = vrot.slane %v410_v40, 2 }
 0x1e8   : > { %v1655_v50 = vsel %vm1648_vm10, %v1622_v3, %v1334_v55  ;;  %1278 = vrot.lane.b32.xlu1 %v918_v53, %s2408_s11  ;;  %2296 = vmatprep.mubr.msk.f32.mxu1 %vm1693_vm11, %v1671_v43  ;;  %v1317_v3 = vrot.slane %v411_v47, 2 }
 0x1e9   : > { %1246 = vrot.lane.b32.xlu0 %v4532_v49, %s2408_s11  ;;  %2272 = vmatprep.mubr.msk.f32.mxu0 %vm1693_vm11, %v1655_v50 }
 0x1ea   : > { %v3940_v18 = vpop.permute.xlu1 %969  ;;  %v1318_v58 = vsel %vm638_vm1, %v1316_v13, %v1317_v3  ;;  %v1320_v34 = vsel %vm638_vm1, %v1317_v3, %v1319_v19 }
 0x1eb   : > { %v3942_v44 = vpop.permute.xlu0 %937 }
 0x1ec   : > { %1377 = vrot.lane.b32.xlu1 %v1017_v28, %s2409_s23 }
 0x1ed   : > { %1345 = vrot.lane.b32.xlu0 %v4533_v26, %s2409_s23 }
 0x1ee   : > { %v1069_v2 = vpop.permute.xlu1 %1068 }
 0x1ef   : > { %v1037_v24 = vpop.permute.xlu0 %1036 }
 0x1f0   : > { %981 = vrot.lane.b32.xlu1 %v918_v53, %s2405_s30  ;;  %v1218_v53 = vrot.slane %v412_v56, 1 }
 0x1f1   : > { %949 = vrot.lane.b32.xlu0 %v4532_v49, %s2405_s30  ;;  %v1525_v49 = vsel %vm1516_vm6, %v3353_v6, %v3909_v41 }
 0x1f2   : > { %v1368_v33 = vpop.permute.xlu1 %1367  ;;  %v1219_v43 = vsel %vm461_vm0, %v1216_v39, %v1218_v53 }
 0x1f3   : > { %v1672_v14 = vsel %vm1648_vm10, %v1639_v5, %v1368_v33  ;;  %v1336_v61 = vpop.permute.xlu0 %1335 }
 0x1f4   : > { %v1656_v4 = vsel %vm1648_vm10, %v1623_v1, %v1336_v61  ;;  %1080 = vrot.lane.b32.xlu1 %v1017_v28, %s2406_s5  ;;  %2297 = vmatmul.mubr.msk.f32.gmra.mrb[6].mxu1 %vm1693_vm11, %v1672_v14  ;;  %v4538_v1 = vld [vmem:[#allocation45_spill] sm:$0xff]  ;;  %v1542_v61 = vsel %vm1516_vm6, %v3486_v32, %v3940_v18 }
 0x1f5   : > { %1048 = vrot.lane.b32.xlu0 %v4533_v26, %s2406_s5  ;;  %2273 = vmatmul.mubr.msk.f32.gmra.mrb[6].mxu0 %vm1693_vm11, %v1656_v4  ;;  %v1558_v26 = vsel %vm1549_vm7, %v1525_v49, %v1037_v24 }
 0x1f6   : > { %v1071_v10 = vpop.permute.xlu1 %1070 }
 0x1f7   : > { %v1039_v29 = vpop.permute.xlu0 %1038 }
 0x1f8   : > { %1379 = vrot.lane.b32.xlu1 %v1019_v37, %s2409_s23 }
 0x1f9   : > { %1347 = vrot.lane.b32.xlu0 %v4534_v20, %s2409_s23 }
 0x1fa   : > { %v1167_v42 = vpop.permute.xlu1 %1166 }
 0x1fb   : > { %v1135_v36 = vpop.permute.xlu0 %1134 }
 0x1fc   : > { %1082 = vrot.lane.b32.xlu1 %v1019_v37, %s2406_s5  ;;  %v1526_v37 = vsel %vm1516_vm6, %v3350_v22, %v3942_v44 }
 0x1fd   : > { %1050 = vrot.lane.b32.xlu0 %v4534_v20, %s2406_s5  ;;  %v1575_v20 = vsel %vm1549_vm7, %v1542_v61, %v1071_v10 }
 0x1fe   : > { %v1169_v48 = vpop.permute.xlu1 %1168 }
 0x1ff   : > { %v1137_v52 = vpop.permute.xlu0 %1136 }
 0x200   : > { %1178 = vrot.lane.b32.xlu1 %v410_v40, %s2407_s6 }
 0x201   : > { %1146 = vrot.lane.b32.xlu0 %v3723_v12, %s2407_s6  ;;  %v4535_v12 = vld [vmem:[#allocation14_spill] sm:$0xff] }
 0x202   : > { %v1269_v51 = vpop.permute.xlu1 %1268 }
 0x203   : > { %v1237_v15 = vpop.permute.xlu0 %1236 }
 0x204   : > { %1180 = vrot.lane.b32.xlu1 %v411_v47, %s2407_s6 }
 0x205   : > { %1148 = vrot.lane.b32.xlu0 %v3782_v31, %s2407_s6  ;;  %v1541_v31 = vsel %vm1516_vm6, %v3489_v27, %v3906_v21  ;;  %v1591_v27 = vsel %vm1582_vm8, %v1558_v26, %v1135_v36  ;;  %v1608_v36 = vsel %vm1582_vm8, %v1575_v20, %v1169_v48  ;;  %v4074_v20 = vld [vmem:[%s4254_s3] ss:$0 sm:$0xff] }
 0x206   : > { %v972_v25 = vpop.permute.xlu1 %971  ;;  %v1574_v28 = vsel %vm1549_vm7, %v1541_v31, %v1069_v2  ;;  %v1624_v6 = vsel %vm1615_vm9, %v1591_v27, %v1237_v15 }
 0x207   : > { %v3986_v62 = vpop.permute.xlu0 %939  ;;  %v1607_v63 = vsel %vm1582_vm8, %v1574_v28, %v1167_v42  ;;  %v1559_v42 = vsel %vm1549_vm7, %v1526_v37, %v1039_v29  ;;  %v1543_v3 = vsel %vm1516_vm6, %v3509_v23, %v972_v25 }
 0x208   : > { %1280 = vrot.lane.b32.xlu1 %v1217_v11, %s2408_s11  ;;  %v1640_v21 = vsel %vm1615_vm9, %v1607_v63, %v1269_v51  ;;  %v1592_v40 = vsel %vm1582_vm8, %v1559_v42, %v1137_v52 }
 0x209   : > { %1248 = vrot.lane.b32.xlu0 %v4535_v12, %s2408_s11 }
 0x20a   : > { %v1271_v55 = vpop.permute.xlu1 %1270 }
 0x20b   : > { %v1239_v50 = vpop.permute.xlu0 %1238  ;;  %v1641_v47 = vsel %vm1615_vm9, %v1608_v36, %v1271_v55 }
 0x20c   : > { %1282 = vrot.lane.b32.xlu1 %v1219_v43, %s2408_s11  ;;  %v1625_v39 = vsel %vm1615_vm9, %v1592_v40, %v1239_v50  ;;  %v1527_v43 = vsel %vm1516_vm6, %v3373_v38, %v3986_v62 }
 0x20d   : > { %1250 = vrot.lane.b32.xlu0 %v4536_v59, %s2408_s11 }
 0x20e   : > { %v1370_v7 = vpop.permute.xlu1 %1369 }
 0x20f   : > { %v1673_v41 = vsel %vm1648_vm10, %v1640_v21, %v1370_v7  ;;  %v1338_v2 = vpop.permute.xlu0 %1337 }
 0x210   : > { %v1657_v24 = vsel %vm1648_vm10, %v1624_v6, %v1338_v2  ;;  %1381 = vrot.lane.b32.xlu1 %v1318_v58, %s2409_s23  ;;  %2299 = vmatprep.mubr.msk.f32.mxu1 %vm1693_vm11, %v1673_v41 }
 0x211   : > { %1349 = vrot.lane.b32.xlu0 %v4537_v45, %s2409_s23  ;;  %2275 = vmatprep.mubr.msk.f32.mxu0 %vm1693_vm11, %v1657_v24 }
 0x212   : > { %v974_v5 = vpop.permute.xlu1 %973 }
 0x213   : > { %v942_v33 = vpop.permute.xlu0 %941  ;;  %v1544_v19 = vsel %vm1516_vm6, %v3506_v30, %v974_v5 }
 0x214   : > { %1383 = vrot.lane.b32.xlu1 %v1320_v34, %s2409_s23  ;;  %v1528_v21 = vsel %vm1516_vm6, %v3370_v17, %v942_v33 }
 0x215   : > { %1351 = vrot.lane.b32.xlu0 %v4538_v1, %s2409_s23 }
 0x216   : > { %v1073_v14 = vpop.permute.xlu1 %1072 }
 0x217   : > { %v1041_v4 = vpop.permute.xlu0 %1040  ;;  %v1576_v55 = vsel %vm1549_vm7, %v1543_v3, %v1073_v14 }
 0x218   : > { %v1560_v31 = vsel %vm1549_vm7, %v1527_v43, %v1041_v4 }
 0x21a   : > { %v1372_v60 = vpop.permute.xlu1 %1371 }
 0x21b   : > { %v1674_v32 = vsel %vm1648_vm10, %v1641_v47, %v1372_v60  ;;  %v1340_v18 = vpop.permute.xlu0 %1339 }
 0x21c   : > { %v1658_v51 = vsel %vm1648_vm10, %v1625_v39, %v1340_v18  ;;  %2300 = vmatmul.mubr.msk.f32.gmra.mrb[8].mxu1 %vm1693_vm11, %v1674_v32 }
 0x21d   : > { %2276 = vmatmul.mubr.msk.f32.gmra.mrb[8].mxu0 %vm1693_vm11, %v1658_v51 }
 0x21e   : > { %v1075_v22 = vpop.permute.xlu1 %1074 }
 0x21f   : > { %v1043_v44 = vpop.permute.xlu0 %1042  ;;  %v1577_v7 = vsel %vm1549_vm7, %v1544_v19, %v1075_v22 }
 0x220   : > { %v1561_v6 = vsel %vm1549_vm7, %v1528_v21, %v1043_v44 }
 0x222   : > { %v1171_v10 = vpop.permute.xlu1 %1170 }
 0x223   : > { %v1139_v29 = vpop.permute.xlu0 %1138  ;;  %v1609_v50 = vsel %vm1582_vm8, %v1576_v55, %v1171_v10 }
 0x224   : > { %v1593_v49 = vsel %vm1582_vm8, %v1560_v31, %v1139_v29 }
 0x226   : > { %v1173_v48 = vpop.permute.xlu1 %1172 }
 0x227   : > { %v1141_v52 = vpop.permute.xlu0 %1140  ;;  %v1610_v41 = vsel %vm1582_vm8, %v1577_v7, %v1173_v48 }
 0x228   : > { %v1594_v2 = vsel %vm1582_vm8, %v1561_v6, %v1141_v52 }
 0x22a   : > { %v1273_v56 = vpop.permute.xlu1 %1272 }
 0x22b   : > { %v1241_v15 = vpop.permute.xlu0 %1240  ;;  %v1642_v28 = vsel %vm1615_vm9, %v1609_v50, %v1273_v56 }
 0x22c   : > { %v1626_v63 = vsel %vm1615_vm9, %v1593_v49, %v1241_v15 }
 0x22e   : > { %v976_v11 = vpop.permute.xlu1 %975 }
 0x22f   : > { %v4035_v53 = vpop.permute.xlu0 %943  ;;  %v1545_v48 = vsel %vm1516_vm6, %v3529_v8, %v976_v11 }
 0x230   : > { %v1529_v56 = vsel %vm1516_vm6, %v3393_v46, %v4035_v53 }
 0x232   : > { %v1275_v13 = vpop.permute.xlu1 %1274 }
 0x233   : > { %v1243_v12 = vpop.permute.xlu0 %1242  ;;  %v1643_v24 = vsel %vm1615_vm9, %v1610_v41, %v1275_v13 }
 0x234   : > { %v1627_v34 = vsel %vm1615_vm9, %v1594_v2, %v1243_v12 }
 0x236   : > { %v1374_v26 = vpop.permute.xlu1 %1373 }
 0x237   : > { %v1675_v23 = vsel %vm1648_vm10, %v1642_v28, %v1374_v26  ;;  %v1342_v25 = vpop.permute.xlu0 %1341 }
 0x238   : > { %v1659_v59 = vsel %vm1648_vm10, %v1626_v63, %v1342_v25  ;;  %2302 = vmatprep.mubr.msk.f32.mxu1 %vm1693_vm11, %v1675_v23 }
 0x239   : > { %2278 = vmatprep.mubr.msk.f32.mxu0 %vm1693_vm11, %v1659_v59 }
 0x23a   : > { %v4052_v38 = vpop.permute.xlu1 %977 }
 0x23b   : > { %v4054_v62 = vpop.permute.xlu0 %945  ;;  %v1546_v28 = vsel %vm1516_vm6, %v3526_v57, %v4052_v38 }
 0x23c   : > { %v1530_v63 = vsel %vm1516_vm6, %v3390_v9, %v4054_v62 }
 0x23e   : > { %v1077_v58 = vpop.permute.xlu1 %1076 }
 0x23f   : > { %v1045_v27 = vpop.permute.xlu0 %1044  ;;  %v1578_v15 = vsel %vm1549_vm7, %v1545_v48, %v1077_v58 }
 0x240   : > { %v1562_v13 = vsel %vm1549_vm7, %v1529_v56, %v1045_v27 }
 0x242   : > { %v1376_v45 = vpop.permute.xlu1 %1375 }
 0x243   : > { %v1676_v30 = vsel %vm1648_vm10, %v1643_v24, %v1376_v45  ;;  %v1344_v5 = vpop.permute.xlu0 %1343 }
 0x244   : > { %v1660_v1 = vsel %vm1648_vm10, %v1627_v34, %v1344_v5  ;;  %2303 = vmatmul.mubr.msk.f32.gmra.mrb[10].mxu1 %vm1693_vm11, %v1676_v30 }
 0x245   : > { %2279 = vmatmul.mubr.msk.f32.gmra.mrb[10].mxu0 %vm1693_vm11, %v1660_v1 }
 0x246   : > { %v1079_v17 = vpop.permute.xlu1 %1078 }
 0x247   : > { %v1047_v33 = vpop.permute.xlu0 %1046  ;;  %v1579_v23 = vsel %vm1549_vm7, %v1546_v28, %v1079_v17 }
 0x248   : > { %v1563_v25 = vsel %vm1549_vm7, %v1530_v63, %v1047_v33 }
 0x24a   : > { %v1175_v14 = vpop.permute.xlu1 %1174 }
 0x24b   : > { %v1143_v61 = vpop.permute.xlu0 %1142  ;;  %v1611_v3 = vsel %vm1582_vm8, %v1578_v15, %v1175_v14 }
 0x24c   : > { %v1595_v12 = vsel %vm1582_vm8, %v1562_v13, %v1143_v61 }
 0x24e   : > { %v1177_v4 = vpop.permute.xlu1 %1176 }
 0x24f   : > { %v1145_v37 = vpop.permute.xlu0 %1144  ;;  %v1612_v59 = vsel %vm1582_vm8, %v1579_v23, %v1177_v4 }
 0x250   : > { %v1596_v58 = vsel %vm1582_vm8, %v1563_v25, %v1145_v37 }
 0x252   : > { %v1277_v42 = vpop.permute.xlu1 %1276 }
 0x253   : > { %v1245_v36 = vpop.permute.xlu0 %1244  ;;  %v2265_v40 = vpop.f32.mrb[0].mxu0  ;;  %v1644_v43 = vsel %vm1615_vm9, %v1611_v3, %v1277_v42 }
 0x254   : > { %v1866_v47 = vadd.f32 %v2265_v40, %v4074_v20  ;;  %v1860_v60 = vpop.f32.mrb[1].mxu0  ;;  %v1628_v11 = vsel %vm1615_vm9, %v1595_v12, %v1245_v36 }
 0x255   : > { %v1861_v39 = vadd.f32 %v4074_v20, %v1860_v60 }
 0x256   : > { %2020 = vst.msk [vmem:[%s4079_s28 + $0x8] sm:$0xff] %vm1450_vm4, %v1866_v47  ;;  %v4085_v32 = vpop.permute.xlu1 %979 }
 0x257   : > { %2019 = vst.msk [vmem:[%s4079_s28] sm:$0xff] %vm1450_vm4, %v1861_v39  ;;  %v4089_v18 = vpop.permute.xlu0 %947  ;;  %v1547_v42 = vsel %vm1516_vm6, %v3549_v0, %v4085_v32 }
 0x258   : > { %v2289_v51 = vpop.f32.mrb[0].mxu1  ;;  %v1531_v40 = vsel %vm1516_vm6, %v3413_v54, %v4089_v18 }
 0x259   : > { %v1946_v22 = vadd.f32 %v2289_v51, %v4074_v20  ;;  %v1940_v44 = vpop.f32.mrb[1].mxu1 }
 0x25a   : > { %v1941_v10 = vadd.f32 %v4074_v20, %v1940_v44  ;;  %v1279_v29 = vpop.permute.xlu1 %1278 }
 0x25b   : > { %2036 = vst.msk [vmem:[%s4079_s28 + $0x88] sm:$0xff] %vm1450_vm4, %v1946_v22  ;;  %v1247_v52 = vpop.permute.xlu0 %1246  ;;  %v1645_v19 = vsel %vm1615_vm9, %v1612_v59, %v1279_v29 }
 0x25c   : > { %2035 = vst.msk [vmem:[%s4079_s28 + $0x80] sm:$0xff] %vm1450_vm4, %v1941_v10  ;;  %v1629_v21 = vsel %vm1615_vm9, %v1596_v58, %v1247_v52 }
 0x25e   : > { %v1378_v8 = vpop.permute.xlu1 %1377 }
 0x25f   : > { %v1677_v55 = vsel %vm1648_vm10, %v1644_v43, %v1378_v8  ;;  %v1346_v31 = vpop.permute.xlu0 %1345 }
 0x260   : > { %v1661_v46 = vsel %vm1648_vm10, %v1628_v11, %v1346_v31  ;;  %2305 = vmatprep.mubr.msk.f32.mxu1 %vm1693_vm11, %v1677_v55 }
 0x261   : > { %2281 = vmatprep.mubr.msk.f32.mxu0 %vm1693_vm11, %v1661_v46 }
 0x262   : > { %v982_v53 = vpop.permute.xlu1 %981 }
 0x263   : > { %v950_v50 = vpop.permute.xlu0 %949  ;;  %v1548_v32 = vsel %vm1516_vm6, %v3546_v16, %v982_v53 }
 0x264   : > { %v1532_v10 = vsel %vm1516_vm6, %v3410_v35, %v950_v50 }
 0x266   : > { %v1081_v49 = vpop.permute.xlu1 %1080 }
 0x267   : > { %v1049_v26 = vpop.permute.xlu0 %1048  ;;  %v1580_v47 = vsel %vm1549_vm7, %v1547_v42, %v1081_v49 }
 0x268   : > { %v1564_v60 = vsel %vm1549_vm7, %v1531_v40, %v1049_v26 }
 0x26a   : > { %v1380_v27 = vpop.permute.xlu1 %1379 }
 0x26b   : > { %v1678_v57 = vsel %vm1648_vm10, %v1645_v19, %v1380_v27  ;;  %v1348_v38 = vpop.permute.xlu0 %1347 }
 0x26c   : > { %v1662_v9 = vsel %vm1648_vm10, %v1629_v21, %v1348_v38  ;;  %2306 = vmatmul.mubr.msk.f32.gmra.mrb[12].mxu1 %vm1693_vm11, %v1678_v57 }
 0x26d   : > { %2282 = vmatmul.mubr.msk.f32.gmra.mrb[12].mxu0 %vm1693_vm11, %v1662_v9 }
 0x26e   : > { %v1083_v62 = vpop.permute.xlu1 %1082 }
 0x26f   : > { %v1051_v7 = vpop.permute.xlu0 %1050  ;;  %v1581_v29 = vsel %vm1549_vm7, %v1548_v32, %v1083_v62 }
 0x270   : > { %v1565_v52 = vsel %vm1549_vm7, %v1532_v10, %v1051_v7 }
 0x272   : > { %v1179_v6 = vpop.permute.xlu1 %1178 }
 0x273   : > { %v1147_v41 = vpop.permute.xlu0 %1146  ;;  %v1613_v39 = vsel %vm1582_vm8, %v1580_v47, %v1179_v6 }
 0x274   : > { %v1597_v51 = vsel %vm1582_vm8, %v1564_v60, %v1147_v41 }
 0x276   : > { %v1181_v2 = vpop.permute.xlu1 %1180 }
 0x277   : > { %v1149_v24 = vpop.permute.xlu0 %1148  ;;  %v2268_v45 = vpop.f32.mrb[2].mxu0  ;;  %v1614_v56 = vsel %vm1582_vm8, %v1581_v29, %v1181_v2 }
 0x278   : > { %v1876_v34 = vadd.f32 %v2268_v45, %v4074_v20  ;;  %v1870_v30 = vpop.f32.mrb[3].mxu0  ;;  %v1598_v16 = vsel %vm1582_vm8, %v1565_v52, %v1149_v24 }
 0x279   : > { %v1871_v5 = vadd.f32 %v4074_v20, %v1870_v30 }
 0x27a   : > { %2022 = vst.msk [vmem:[%s4079_s28 + $0x18] sm:$0xff] %vm1450_vm4, %v1876_v34  ;;  %v1281_v1 = vpop.permute.xlu1 %1280 }
 0x27b   : > { %2021 = vst.msk [vmem:[%s4079_s28 + $0x10] sm:$0xff] %vm1450_vm4, %v1871_v5  ;;  %v1249_v17 = vpop.permute.xlu0 %1248  ;;  %v1646_v22 = vsel %vm1615_vm9, %v1613_v39, %v1281_v1 }
 0x27c   : > { %v2292_v33 = vpop.f32.mrb[2].mxu1  ;;  %v1630_v44 = vsel %vm1615_vm9, %v1597_v51, %v1249_v17 }
 0x27d   : > { %v1956_v14 = vadd.f32 %v2292_v33, %v4074_v20  ;;  %v1950_v61 = vpop.f32.mrb[3].mxu1 }
 0x27e   : > { %v1951_v4 = vadd.f32 %v4074_v20, %v1950_v61  ;;  %v1283_v37 = vpop.permute.xlu1 %1282 }
 0x27f   : > { %2038 = vst.msk [vmem:[%s4079_s28 + $0x98] sm:$0xff] %vm1450_vm4, %v1956_v14  ;;  %v1251_v36 = vpop.permute.xlu0 %1250  ;;  %v1647_v15 = vsel %vm1615_vm9, %v1614_v56, %v1283_v37 }
 0x280   : > { %2037 = vst.msk [vmem:[%s4079_s28 + $0x90] sm:$0xff] %vm1450_vm4, %v1951_v4  ;;  %v1631_v35 = vsel %vm1615_vm9, %v1598_v16, %v1251_v36 }
 0x282   : > { %v1382_v0 = vpop.permute.xlu1 %1381 }
 0x283   : > { %v1679_v54 = vsel %vm1648_vm10, %v1646_v22, %v1382_v0  ;;  %v1350_v18 = vpop.permute.xlu0 %1349 }
 0x284   : > { %v1663_v48 = vsel %vm1648_vm10, %v1630_v44, %v1350_v18  ;;  %2308 = vmatprep.mubr.msk.f32.mxu1 %vm1693_vm11, %v1679_v54 }
 0x285   : > { %2284 = vmatprep.mubr.msk.f32.mxu0 %vm1693_vm11, %v1663_v48 }
 0x286   : > { %v1384_v13 = vpop.permute.xlu1 %1383 }
 0x287   : > { %v1680_v3 = vsel %vm1648_vm10, %v1647_v15, %v1384_v13  ;;  %v1352_v12 = vpop.permute.xlu0 %1351 }
 0x288   : > { %v1664_v43 = vsel %vm1648_vm10, %v1631_v35, %v1352_v12  ;;  %2309 = vmatmul.mubr.msk.f32.gmra.mrb[14].mxu1 %vm1693_vm11, %v1680_v3 }
 0x289   : > { %2285 = vmatmul.mubr.msk.f32.gmra.mrb[14].mxu0 %vm1693_vm11, %v1664_v43 }
 0x29f   : > { %v2295_v8 = vpop.f32.mrb[4].mxu1 }
 0x2a0   : > { %v2271_v11 = vpop.f32.mrb[4].mxu0  ;;  %v1966_v55 = vadd.f32 %v2295_v8, %v4074_v20  ;;  %v1960_v31 = vpop.f32.mrb[5].mxu1 }
 0x2a1   : > { %v1886_v46 = vadd.f32 %v2271_v11, %v4074_v20  ;;  %v1880_v53 = vpop.f32.mrb[5].mxu0  ;;  %v1961_v50 = vadd.f32 %v4074_v20, %v1960_v31 }
 0x2a2   : > { %2040 = vst.msk [vmem:[%s4079_s28 + $0xa8] sm:$0xff] %vm1450_vm4, %v1966_v55  ;;  %v1881_v49 = vadd.f32 %v4074_v20, %v1880_v53 }
 0x2a3   : > { %2024 = vst.msk [vmem:[%s4079_s28 + $0x28] sm:$0xff] %vm1450_vm4, %v1886_v46  ;;  %2039 = vst.msk [vmem:[%s4079_s28 + $0xa0] sm:$0xff] %vm1450_vm4, %v1961_v50 }
 0x2a4   : > { %2023 = vst.msk [vmem:[%s4079_s28 + $0x20] sm:$0xff] %vm1450_vm4, %v1881_v49 }
 0x2c7   : > { %v2298_v28 = vpop.f32.mrb[6].mxu1 }
 0x2c8   : > { %v2274_v26 = vpop.f32.mrb[6].mxu0  ;;  %v1976_v63 = vadd.f32 %v2298_v28, %v4074_v20  ;;  %v1970_v23 = vpop.f32.mrb[7].mxu1 }
 0x2c9   : > { %v1896_v25 = vadd.f32 %v2274_v26, %v4074_v20  ;;  %v1890_v59 = vpop.f32.mrb[7].mxu0  ;;  %v1971_v58 = vadd.f32 %v4074_v20, %v1970_v23 }
 0x2ca   : > { %2042 = vst.msk [vmem:[%s4079_s28 + $0xb8] sm:$0xff] %vm1450_vm4, %v1976_v63  ;;  %v1891_v19 = vadd.f32 %v4074_v20, %v1890_v59 }
 0x2cb   : > { %2026 = vst.msk [vmem:[%s4079_s28 + $0x38] sm:$0xff] %vm1450_vm4, %v1896_v25  ;;  %2041 = vst.msk [vmem:[%s4079_s28 + $0xb0] sm:$0xff] %vm1450_vm4, %v1971_v58 }
 0x2cc   : > { %2025 = vst.msk [vmem:[%s4079_s28 + $0x30] sm:$0xff] %vm1450_vm4, %v1891_v19 }
 0x2ef   : > { %v2301_v27 = vpop.f32.mrb[8].mxu1 }
 0x2f0   : > { %v2277_v21 = vpop.f32.mrb[8].mxu0  ;;  %v1986_v57 = vadd.f32 %v2301_v27, %v4074_v20  ;;  %v1980_v38 = vpop.f32.mrb[9].mxu1 }
 0x2f1   : > { %v1906_v9 = vadd.f32 %v2277_v21, %v4074_v20  ;;  %v1900_v62 = vpop.f32.mrb[9].mxu0  ;;  %v1981_v7 = vadd.f32 %v4074_v20, %v1980_v38 }
 0x2f2   : > { %2044 = vst.msk [vmem:[%s4079_s28 + $0xc8] sm:$0xff] %vm1450_vm4, %v1986_v57  ;;  %v1901_v6 = vadd.f32 %v4074_v20, %v1900_v62 }
 0x2f3   : > { %2028 = vst.msk [vmem:[%s4079_s28 + $0x48] sm:$0xff] %vm1450_vm4, %v1906_v9  ;;  %2043 = vst.msk [vmem:[%s4079_s28 + $0xc0] sm:$0xff] %vm1450_vm4, %v1981_v7 }
 0x2f4   : > { %2027 = vst.msk [vmem:[%s4079_s28 + $0x40] sm:$0xff] %vm1450_vm4, %v1901_v6 }
 0x317   : > { %v2304_v41 = vpop.f32.mrb[10].mxu1 }
 0x318   : > { %v2280_v2 = vpop.f32.mrb[10].mxu0  ;;  %v1996_v24 = vadd.f32 %v2304_v41, %v4074_v20  ;;  %v1990_v45 = vpop.f32.mrb[11].mxu1 }
 0x319   : > { %v1916_v34 = vadd.f32 %v2280_v2, %v4074_v20  ;;  %v1910_v30 = vpop.f32.mrb[11].mxu0  ;;  %v1991_v5 = vadd.f32 %v4074_v20, %v1990_v45 }
 0x31a   : > { %2046 = vst.msk [vmem:[%s4079_s28 + $0xd8] sm:$0xff] %vm1450_vm4, %v1996_v24  ;;  %v1911_v1 = vadd.f32 %v4074_v20, %v1910_v30 }
 0x31b   : > { %2030 = vst.msk [vmem:[%s4079_s28 + $0x58] sm:$0xff] %vm1450_vm4, %v1916_v34  ;;  %2045 = vst.msk [vmem:[%s4079_s28 + $0xd0] sm:$0xff] %vm1450_vm4, %v1991_v5 }
 0x31c   : > { %2029 = vst.msk [vmem:[%s4079_s28 + $0x50] sm:$0xff] %vm1450_vm4, %v1911_v1 }
 0x33f   : > { %v2307_v17 = vpop.f32.mrb[12].mxu1 }
 0x340   : > { %v2283_v33 = vpop.f32.mrb[12].mxu0  ;;  %v2006_v14 = vadd.f32 %v2307_v17, %v4074_v20  ;;  %v2000_v61 = vpop.f32.mrb[13].mxu1 }
 0x341   : > { %v1926_v4 = vadd.f32 %v2283_v33, %v4074_v20  ;;  %v1920_v37 = vpop.f32.mrb[13].mxu0  ;;  %v2001_v42 = vadd.f32 %v4074_v20, %v2000_v61 }
 0x342   : > { %2048 = vst.msk [vmem:[%s4079_s28 + $0xe8] sm:$0xff] %vm1450_vm4, %v2006_v14  ;;  %v1921_v36 = vadd.f32 %v4074_v20, %v1920_v37 }
 0x343   : > { %2032 = vst.msk [vmem:[%s4079_s28 + $0x68] sm:$0xff] %vm1450_vm4, %v1926_v4  ;;  %2047 = vst.msk [vmem:[%s4079_s28 + $0xe0] sm:$0xff] %vm1450_vm4, %v2001_v42 }
 0x344   : > { %2031 = vst.msk [vmem:[%s4079_s28 + $0x60] sm:$0xff] %vm1450_vm4, %v1921_v36 }
 0x35b   : > { %v2310_v40 = vpop.f32.mrb[14].mxu1 }
 0x35c   : > { %v2286_v47 = vpop.f32.mrb[14].mxu0  ;;  %v2016_v60 = vadd.f32 %v2310_v40, %v4074_v20  ;;  %v2010_v39 = vpop.f32.mrb[15].mxu1 }
 0x35d   : > { %v1936_v51 = vadd.f32 %v2286_v47, %v4074_v20  ;;  %v1930_v22 = vpop.f32.mrb[15].mxu0  ;;  %v2011_v0 = vadd.f32 %v4074_v20, %v2010_v39 }
 0x35e   : > { %2050 = vst.msk [vmem:[%s4079_s28 + $0xf8] sm:$0xff] %vm1450_vm4, %v2016_v60  ;;  %v1931_v32 = vadd.f32 %v4074_v20, %v1930_v22 }
 0x35f   : > { %2034 = vst.msk [vmem:[%s4079_s28 + $0x78] sm:$0xff] %vm1450_vm4, %v1936_v51  ;;  %2049 = vst.msk [vmem:[%s4079_s28 + $0xf0] sm:$0xff] %vm1450_vm4, %v2011_v0 }
 0x360   : > { %2033 = vst.msk [vmem:[%s4079_s28 + $0x70] sm:$0xff] %vm1450_vm4, %v1931_v32 }
 0x361 PF: > { %s14_s17 = sadd.s32 1, %s2400_s17   ;;  %s4539_s15 = smov %s2396_s16 }
 0x362   : > { %p11_p5 = scmp.ge.s32.totalorder %s14_s17, 4   ;;  %s4540_s16 = smov %s4542_s18 }
 0x364   :  { %13 = sbr.rel (!%p11_p5) target bundleno = 2 (0x2), region = 69 }

</bundles_post_ra>
